<compile_context>
chip_gen: v5e
topology: v5e:2x2
jax: 0.10.0
libtpu: 0.0.40
codegen_flags: <defaults>
</compile_context>

<pallas_src>
import functools

import jax
import jax.numpy as jnp
from jax.experimental import pallas as pl
from jax.experimental.pallas import tpu as pltpu

LANE = 128
SUBLANE = 8


def _round_up(x, m):
    return (x + m - 1) // m * m


# ----------------------------------------------------------------------------
# Fused Pallas kernel: whole VAE forward for one batch tile.
# ----------------------------------------------------------------------------
def _vae_fused_kernel(*refs, n_enc, n_mid, leak, latent_pad):
    """refs = [x, eps,
               (w,b) * n_enc encoder layers,
               w_mulv, b_mulv            (fc_mean | fc_logvar concatenated),
               w_di, b_di                (decoder_input),
               (w,b) * n_mid decoder-mid layers,
               w_do, b_do                (final decoder Linear),
               xhat_out, mean_out, logvar_out]"""
    it = iter(refs)
    x_ref = next(it)
    eps_ref = next(it)
    enc = [(next(it), next(it)) for _ in range(n_enc)]
    w_mulv_ref, b_mulv_ref = next(it), next(it)
    w_di_ref, b_di_ref = next(it), next(it)
    mid = [(next(it), next(it)) for _ in range(n_mid)]
    w_do_ref, b_do_ref = next(it), next(it)
    xhat_ref = next(it)
    mean_ref = next(it)
    logvar_ref = next(it)

    def leaky(y):
        return jnp.where(y >= 0, y, leak * y)

    # ---- encoder ----
    h = x_ref[...]
    for w_ref, b_ref in enc:
        h = leaky(jnp.dot(h, w_ref[...], preferred_element_type=jnp.float32)
                  + b_ref[...])

    # ---- fused fc_mean / fc_logvar (single MXU dot) ----
    s = jnp.dot(h, w_mulv_ref[...], preferred_element_type=jnp.float32) \
        + b_mulv_ref[...]
    mean = s[:, :latent_pad]          # lane-aligned static slices
    logvar = s[:, latent_pad:]
    mean_ref[...] = mean
    logvar_ref[...] = logvar

    # ---- reparameterization: z = mean + exp(0.5*logvar) * eps ----
    z = mean + jnp.exp(0.5 * logvar) * eps_ref[...]

    # ---- decoder (decoder_input Linear then LeakyReLU, mid layers, out) ----
    h = leaky(jnp.dot(z, w_di_ref[...], preferred_element_type=jnp.float32)
              + b_di_ref[...])
    for w_ref, b_ref in mid:
        h = leaky(jnp.dot(h, w_ref[...], preferred_element_type=jnp.float32)
                  + b_ref[...])
    y = jnp.dot(h, w_do_ref[...], preferred_element_type=jnp.float32) \
        + b_do_ref[...]
    xhat_ref[...] = jax.nn.sigmoid(y)


# ----------------------------------------------------------------------------
# Parameter construction (PyTorch-default-like uniform init), unpadded.
# ----------------------------------------------------------------------------
def _init_linear(key, fan_in, fan_out):
    kw, kb = jax.random.split(key)
    bound = 1.0 / jnp.sqrt(jnp.float32(fan_in))
    w = jax.random.uniform(kw, (fan_in, fan_out), jnp.float32, -bound, bound)
    b = jax.random.uniform(kb, (fan_out,), jnp.float32, -bound, bound)
    return w, b


def init_vae_params(key, layers, latent_dim):
    raw = {}
    keys = jax.random.split(key, 16)
    k = iter(keys)

    raw["encoder"] = [
        _init_linear(next(k), li, lo) for li, lo in zip(layers[:-1], layers[1:])
    ]
    raw["fc_mean"] = _init_linear(next(k), layers[-1], latent_dim)
    raw["fc_logvar"] = _init_linear(next(k), layers[-1], latent_dim)
    raw["decoder_input"] = _init_linear(next(k), latent_dim, layers[-1])
    rev = list(reversed(layers))
    raw["decoder_mid"] = [
        _init_linear(next(k), li, lo) for li, lo in zip(rev[:-2], rev[1:-1])
    ]
    raw["decoder_out"] = _init_linear(next(k), layers[1], layers[0])
    return raw


# ----------------------------------------------------------------------------
# Pack: zero-pad every weight/bias to lane multiples, fuse mean|logvar weights.
# ----------------------------------------------------------------------------
def _pad2(w, rows, cols):
    return jnp.zeros((rows, cols), jnp.float32).at[: w.shape[0], : w.shape[1]].set(w)


def _pad_wb(w, b):
    kp = _round_up(w.shape[0], LANE)
    np_ = _round_up(w.shape[1], LANE)
    return _pad2(w, kp, np_), _pad2(b.reshape(1, -1), 1, np_)


def pack_vae_params(raw, layers, latent_dim):
    flat = []
    for w, b in raw["encoder"]:
        flat += list(_pad_wb(w, b))

    latent_pad = _round_up(latent_dim, LANE)
    hid_pad = _round_up(layers[-1], LANE)
    w_mu, b_mu = raw["fc_mean"]
    w_lv, b_lv = raw["fc_logvar"]
    w_mulv = jnp.concatenate(
        [_pad2(w_mu, hid_pad, latent_pad), _pad2(w_lv, hid_pad, latent_pad)], axis=1)
    b_mulv = jnp.concatenate(
        [_pad2(b_mu.reshape(1, -1), 1, latent_pad),
         _pad2(b_lv.reshape(1, -1), 1, latent_pad)], axis=1)
    flat += [w_mulv, b_mulv]

    flat += list(_pad_wb(*raw["decoder_input"]))
    for w, b in raw["decoder_mid"]:
        flat += list(_pad_wb(w, b))
    flat += list(_pad_wb(*raw["decoder_out"]))

    return {
        "flat": flat,
        "n_enc": len(raw["encoder"]),
        "n_mid": len(raw["decoder_mid"]),
        "layers": list(layers),
        "latent_dim": latent_dim,
    }


# ----------------------------------------------------------------------------
# Forward: one fused pallas_call over a (parallel) batch grid.
# ----------------------------------------------------------------------------
def vae_fc_forward(params, x, eps, leak=0.1):
    layers = params["layers"]
    latent = params["latent_dim"]
    in_dim = layers[0]
    in_pad = _round_up(in_dim, LANE)
    latent_pad = _round_up(latent, LANE)

    B = x.shape[0]
    xf = x.reshape(B, -1).astype(jnp.float32)
    assert xf.shape[1] == in_dim

    # Pad batch to sublane multiple; tile at <=128 rows; grid over batch tiles.
    B_pad = _round_up(max(B, SUBLANE), SUBLANE)
    tile_m = min(128, B_pad)
    B_pad = _round_up(B_pad, tile_m)
    grid_m = B_pad // tile_m

    x_p = jnp.zeros((B_pad, in_pad), jnp.float32).at[:B, :in_dim].set(xf)
    eps_p = jnp.zeros((B_pad, latent_pad), jnp.float32).at[:B, :latent].set(
        eps.astype(jnp.float32))

    flat = params["flat"]
    kernel = functools.partial(
        _vae_fused_kernel,
        n_enc=params["n_enc"], n_mid=params["n_mid"],
        leak=leak, latent_pad=latent_pad)

    act_in_spec = pl.BlockSpec((tile_m, in_pad), lambda i: (i, 0))
    eps_spec = pl.BlockSpec((tile_m, latent_pad), lambda i: (i, 0))
    # Weights: constant block index -> DMA'd once, resident across batch tiles.
    weight_specs = [pl.BlockSpec(a.shape, lambda i: (0, 0)) for a in flat]

    out_shape = (
        jax.ShapeDtypeStruct((B_pad, in_pad), jnp.float32),      # x_hat (padded)
        jax.ShapeDtypeStruct((B_pad, latent_pad), jnp.float32),  # mean  (padded)
        jax.ShapeDtypeStruct((B_pad, latent_pad), jnp.float32),  # logvar(padded)
    )
    out_specs = (
        pl.BlockSpec((tile_m, in_pad), lambda i: (i, 0)),
        pl.BlockSpec((tile_m, latent_pad), lambda i: (i, 0)),
        pl.BlockSpec((tile_m, latent_pad), lambda i: (i, 0)),
    )

    xhat_p, mean_p, logvar_p = pl.pallas_call(
        kernel,
        out_shape=out_shape,
        grid=(grid_m,),
        in_specs=[act_in_spec, eps_spec] + weight_specs,
        out_specs=out_specs,
        compiler_params=pltpu.CompilerParams(
            dimension_semantics=("parallel",)),
    )(x_p, eps_p, *flat)

    x_hat = xhat_p[:B, :in_dim].reshape(B, 1, 28, 28)
    mean = mean_p[:B, :latent]
    logvar = logvar_p[:B, :latent]
    return x_hat, mean, logvar


# ----------------------------------------------------------------------------
# Demo + correctness check against a pure-JAX reference
# ----------------------------------------------------------------------------
if __name__ == "__main__":
    # Decoder hard-codes a 28x28 output, so layers[0] must be 784.
    layers = [784, 256, 64]
    latent_dim = 32
    batch = 2
    leak = 0.1

    root = jax.random.PRNGKey(0)
    k_params, k_x, k_eps = jax.random.split(root, 3)

    raw = init_vae_params(k_params, layers, latent_dim)
    params = pack_vae_params(raw, layers, latent_dim)

    x = jax.random.uniform(k_x, (batch, 1, 28, 28), jnp.float32)
    eps = jax.random.normal(k_eps, (batch, latent_dim), jnp.float32)

    x_hat, mean, logvar = vae_fc_forward(params, x, eps, leak=leak)
    jax.block_until_ready((x_hat, mean, logvar))

    assert x_hat.shape == (batch, 1, 28, 28)
    assert mean.shape == (batch, latent_dim)
    assert logvar.shape == (batch, latent_dim)

    def ref_forward(raw, x, eps, leak=0.1):
        h = x.reshape(x.shape[0], -1)
        for w, b in raw["encoder"]:
            h = h @ w + b
            h = jnp.where(h >= 0, h, leak * h)
        mean = h @ raw["fc_mean"][0] + raw["fc_mean"][1]
        logvar = h @ raw["fc_logvar"][0] + raw["fc_logvar"][1]
        z = mean + jnp.exp(0.5 * logvar) * eps
        h = z @ raw["decoder_input"][0] + raw["decoder_input"][1]
        h = jnp.where(h >= 0, h, leak * h)
        for w, b in raw["decoder_mid"]:
            h = h @ w + b
            h = jnp.where(h >= 0, h, leak * h)
        h = h @ raw["decoder_out"][0] + raw["decoder_out"][1]
        h = jax.nn.sigmoid(h)
        return h.reshape(x.shape[0], 1, 28, 28), mean, logvar

    rx, rm, rl = ref_forward(raw, x, eps, leak=leak)
    assert jnp.allclose(x_hat, rx, atol=1e-5, rtol=1e-5)
    assert jnp.allclose(mean, rm, atol=1e-5, rtol=1e-5)
    assert jnp.allclose(logvar, rl, atol=1e-5, rtol=1e-5)

    print("KERNEL_OK")
</pallas_src>

<mosaic_0001>
module attributes {stable_mosaic.version = 11 : i64} {
  func.func @_vae_fused_kernel(%arg0: i32, %arg1: memref<8x896xf32, #tpu.memory_space<vmem>>, %arg2: memref<8x128xf32, #tpu.memory_space<vmem>>, %arg3: memref<896x256xf32, #tpu.memory_space<vmem>>, %arg4: memref<1x256xf32, #tpu.memory_space<vmem>>, %arg5: memref<256x128xf32, #tpu.memory_space<vmem>>, %arg6: memref<1x128xf32, #tpu.memory_space<vmem>>, %arg7: memref<128x256xf32, #tpu.memory_space<vmem>>, %arg8: memref<1x256xf32, #tpu.memory_space<vmem>>, %arg9: memref<128x128xf32, #tpu.memory_space<vmem>>, %arg10: memref<1x128xf32, #tpu.memory_space<vmem>>, %arg11: memref<128x256xf32, #tpu.memory_space<vmem>>, %arg12: memref<1x256xf32, #tpu.memory_space<vmem>>, %arg13: memref<256x896xf32, #tpu.memory_space<vmem>>, %arg14: memref<1x896xf32, #tpu.memory_space<vmem>>, %arg15: memref<8x896xf32, #tpu.memory_space<vmem>>, %arg16: memref<8x128xf32, #tpu.memory_space<vmem>>, %arg17: memref<8x128xf32, #tpu.memory_space<vmem>>) attributes {dimension_semantics = [#tpu.dimension_semantics<parallel>], iteration_bounds = array<i64: 1>, scalar_prefetch = 0 : i64, scratch_operands = 0 : i64, tpu.core_type = #tpu.core_type<tc>, window_params = [{transform_indices = @transform_0, window_bounds = array<i64: 8, 896>}, {transform_indices = @transform_1, window_bounds = array<i64: 8, 128>}, {pipeline_mode = #tpu.pipeline_mode<synchronous>, transform_indices = @transform_2, window_bounds = array<i64: 896, 256>}, {pipeline_mode = #tpu.pipeline_mode<synchronous>, transform_indices = @transform_3, window_bounds = array<i64: 1, 256>}, {pipeline_mode = #tpu.pipeline_mode<synchronous>, transform_indices = @transform_4, window_bounds = array<i64: 256, 128>}, {pipeline_mode = #tpu.pipeline_mode<synchronous>, transform_indices = @transform_5, window_bounds = array<i64: 1, 128>}, {pipeline_mode = #tpu.pipeline_mode<synchronous>, transform_indices = @transform_6, window_bounds = array<i64: 128, 256>}, {pipeline_mode = #tpu.pipeline_mode<synchronous>, transform_indices = @transform_7, window_bounds = array<i64: 1, 256>}, {pipeline_mode = #tpu.pipeline_mode<synchronous>, transform_indices = @transform_8, window_bounds = array<i64: 128, 128>}, {pipeline_mode = #tpu.pipeline_mode<synchronous>, transform_indices = @transform_9, window_bounds = array<i64: 1, 128>}, {pipeline_mode = #tpu.pipeline_mode<synchronous>, transform_indices = @transform_10, window_bounds = array<i64: 128, 256>}, {pipeline_mode = #tpu.pipeline_mode<synchronous>, transform_indices = @transform_11, window_bounds = array<i64: 1, 256>}, {pipeline_mode = #tpu.pipeline_mode<synchronous>, transform_indices = @transform_12, window_bounds = array<i64: 256, 896>}, {pipeline_mode = #tpu.pipeline_mode<synchronous>, transform_indices = @transform_13, window_bounds = array<i64: 1, 896>}, {transform_indices = @transform_14, window_bounds = array<i64: 8, 896>}, {transform_indices = @transform_15, window_bounds = array<i64: 8, 128>}, {transform_indices = @transform_16, window_bounds = array<i64: 8, 128>}]} {
    %c0 = arith.constant 0 : index
    %c0_0 = arith.constant 0 : index
    %0 = vector.load %arg1[%c0, %c0_0] : memref<8x896xf32, #tpu.memory_space<vmem>>, vector<8x896xf32>
    %c0_1 = arith.constant 0 : index
    %c0_2 = arith.constant 0 : index
    %1 = vector.load %arg3[%c0_1, %c0_2] : memref<896x256xf32, #tpu.memory_space<vmem>>, vector<896x256xf32>
    %cst = arith.constant dense<0.000000e+00> : vector<8x256xf32>
    %2 = tpu.matmul %0, %1, %cst {dimension_numbers = #tpu.dot_dimension_numbers<[1], [0], [0], [1], [0, 0, 1, 1], [], []>} : vector<8x896xf32>, vector<896x256xf32>, vector<8x256xf32> -> vector<8x256xf32>
    %c0_3 = arith.constant 0 : index
    %c0_4 = arith.constant 0 : index
    %3 = vector.load %arg4[%c0_3, %c0_4] : memref<1x256xf32, #tpu.memory_space<vmem>>, vector<1x256xf32>
    %4 = vector.broadcast %3 : vector<1x256xf32> to vector<8x256xf32>
    %5 = arith.addf %2, %4 : vector<8x256xf32>
    %cst_5 = arith.constant 0.000000e+00 : f32
    %6 = vector.broadcast %cst_5 : f32 to vector<8x256xf32>
    %7 = arith.cmpf oge, %5, %6 : vector<8x256xf32>
    %cst_6 = arith.constant 1.000000e-01 : f32
    %8 = vector.broadcast %cst_6 : f32 to vector<8x256xf32>
    %9 = arith.mulf %8, %5 : vector<8x256xf32>
    %10 = arith.select %7, %5, %9 : vector<8x256xi1>, vector<8x256xf32>
    %c0_7 = arith.constant 0 : index
    %c0_8 = arith.constant 0 : index
    %11 = vector.load %arg5[%c0_7, %c0_8] : memref<256x128xf32, #tpu.memory_space<vmem>>, vector<256x128xf32>
    %cst_9 = arith.constant dense<0.000000e+00> : vector<8x128xf32>
    %12 = tpu.matmul %10, %11, %cst_9 {dimension_numbers = #tpu.dot_dimension_numbers<[1], [0], [0], [1], [0, 0, 1, 1], [], []>} : vector<8x256xf32>, vector<256x128xf32>, vector<8x128xf32> -> vector<8x128xf32>
    %c0_10 = arith.constant 0 : index
    %c0_11 = arith.constant 0 : index
    %13 = vector.load %arg6[%c0_10, %c0_11] : memref<1x128xf32, #tpu.memory_space<vmem>>, vector<1x128xf32>
    %14 = vector.broadcast %13 : vector<1x128xf32> to vector<8x128xf32>
    %15 = arith.addf %12, %14 : vector<8x128xf32>
    %cst_12 = arith.constant 0.000000e+00 : f32
    %16 = vector.broadcast %cst_12 : f32 to vector<8x128xf32>
    %17 = arith.cmpf oge, %15, %16 : vector<8x128xf32>
    %cst_13 = arith.constant 1.000000e-01 : f32
    %18 = vector.broadcast %cst_13 : f32 to vector<8x128xf32>
    %19 = arith.mulf %18, %15 : vector<8x128xf32>
    %20 = arith.select %17, %15, %19 : vector<8x128xi1>, vector<8x128xf32>
    %c0_14 = arith.constant 0 : index
    %c0_15 = arith.constant 0 : index
    %21 = vector.load %arg7[%c0_14, %c0_15] : memref<128x256xf32, #tpu.memory_space<vmem>>, vector<128x256xf32>
    %cst_16 = arith.constant dense<0.000000e+00> : vector<8x256xf32>
    %22 = tpu.matmul %20, %21, %cst_16 {dimension_numbers = #tpu.dot_dimension_numbers<[1], [0], [0], [1], [0, 0, 1, 1], [], []>} : vector<8x128xf32>, vector<128x256xf32>, vector<8x256xf32> -> vector<8x256xf32>
    %c0_17 = arith.constant 0 : index
    %c0_18 = arith.constant 0 : index
    %23 = vector.load %arg8[%c0_17, %c0_18] : memref<1x256xf32, #tpu.memory_space<vmem>>, vector<1x256xf32>
    %24 = vector.broadcast %23 : vector<1x256xf32> to vector<8x256xf32>
    %25 = arith.addf %22, %24 : vector<8x256xf32>
    %26 = vector.extract_strided_slice %25 {offsets = [0, 0], sizes = [8, 128], strides = [1, 1]} : vector<8x256xf32> to vector<8x128xf32>
    %27 = vector.extract_strided_slice %25 {offsets = [0, 128], sizes = [8, 128], strides = [1, 1]} : vector<8x256xf32> to vector<8x128xf32>
    %c0_19 = arith.constant 0 : index
    %c0_20 = arith.constant 0 : index
    %28 = vector.load %arg16[%c0_19, %c0_20] : memref<8x128xf32, #tpu.memory_space<vmem>>, vector<8x128xf32>
    tpu.vector_store %arg16[%c0_19, %c0_20], %26 {strides = array<i32>} : memref<8x128xf32, #tpu.memory_space<vmem>>, vector<8x128xf32>,
    %c0_21 = arith.constant 0 : index
    %c0_22 = arith.constant 0 : index
    %29 = vector.load %arg17[%c0_21, %c0_22] : memref<8x128xf32, #tpu.memory_space<vmem>>, vector<8x128xf32>
    tpu.vector_store %arg17[%c0_21, %c0_22], %27 {strides = array<i32>} : memref<8x128xf32, #tpu.memory_space<vmem>>, vector<8x128xf32>,
    %cst_23 = arith.constant 5.000000e-01 : f32
    %30 = vector.broadcast %cst_23 : f32 to vector<8x128xf32>
    %31 = arith.mulf %30, %27 : vector<8x128xf32>
    %32 = math.exp %31 : vector<8x128xf32>
    %c0_24 = arith.constant 0 : index
    %c0_25 = arith.constant 0 : index
    %33 = vector.load %arg2[%c0_24, %c0_25] : memref<8x128xf32, #tpu.memory_space<vmem>>, vector<8x128xf32>
    %34 = arith.mulf %32, %33 : vector<8x128xf32>
    %35 = arith.addf %26, %34 : vector<8x128xf32>
    %c0_26 = arith.constant 0 : index
    %c0_27 = arith.constant 0 : index
    %36 = vector.load %arg9[%c0_26, %c0_27] : memref<128x128xf32, #tpu.memory_space<vmem>>, vector<128x128xf32>
    %cst_28 = arith.constant dense<0.000000e+00> : vector<8x128xf32>
    %37 = tpu.matmul %35, %36, %cst_28 {dimension_numbers = #tpu.dot_dimension_numbers<[1], [0], [0], [1], [0, 0, 1, 1], [], []>} : vector<8x128xf32>, vector<128x128xf32>, vector<8x128xf32> -> vector<8x128xf32>
    %c0_29 = arith.constant 0 : index
    %c0_30 = arith.constant 0 : index
    %38 = vector.load %arg10[%c0_29, %c0_30] : memref<1x128xf32, #tpu.memory_space<vmem>>, vector<1x128xf32>
    %39 = vector.broadcast %38 : vector<1x128xf32> to vector<8x128xf32>
    %40 = arith.addf %37, %39 : vector<8x128xf32>
    %cst_31 = arith.constant 0.000000e+00 : f32
    %41 = vector.broadcast %cst_31 : f32 to vector<8x128xf32>
    %42 = arith.cmpf oge, %40, %41 : vector<8x128xf32>
    %cst_32 = arith.constant 1.000000e-01 : f32
    %43 = vector.broadcast %cst_32 : f32 to vector<8x128xf32>
    %44 = arith.mulf %43, %40 : vector<8x128xf32>
    %45 = arith.select %42, %40, %44 : vector<8x128xi1>, vector<8x128xf32>
    %c0_33 = arith.constant 0 : index
    %c0_34 = arith.constant 0 : index
    %46 = vector.load %arg11[%c0_33, %c0_34] : memref<128x256xf32, #tpu.memory_space<vmem>>, vector<128x256xf32>
    %cst_35 = arith.constant dense<0.000000e+00> : vector<8x256xf32>
    %47 = tpu.matmul %45, %46, %cst_35 {dimension_numbers = #tpu.dot_dimension_numbers<[1], [0], [0], [1], [0, 0, 1, 1], [], []>} : vector<8x128xf32>, vector<128x256xf32>, vector<8x256xf32> -> vector<8x256xf32>
    %c0_36 = arith.constant 0 : index
    %c0_37 = arith.constant 0 : index
    %48 = vector.load %arg12[%c0_36, %c0_37] : memref<1x256xf32, #tpu.memory_space<vmem>>, vector<1x256xf32>
    %49 = vector.broadcast %48 : vector<1x256xf32> to vector<8x256xf32>
    %50 = arith.addf %47, %49 : vector<8x256xf32>
    %cst_38 = arith.constant 0.000000e+00 : f32
    %51 = vector.broadcast %cst_38 : f32 to vector<8x256xf32>
    %52 = arith.cmpf oge, %50, %51 : vector<8x256xf32>
    %cst_39 = arith.constant 1.000000e-01 : f32
    %53 = vector.broadcast %cst_39 : f32 to vector<8x256xf32>
    %54 = arith.mulf %53, %50 : vector<8x256xf32>
    %55 = arith.select %52, %50, %54 : vector<8x256xi1>, vector<8x256xf32>
    %c0_40 = arith.constant 0 : index
    %c0_41 = arith.constant 0 : index
    %56 = vector.load %arg13[%c0_40, %c0_41] : memref<256x896xf32, #tpu.memory_space<vmem>>, vector<256x896xf32>
    %cst_42 = arith.constant dense<0.000000e+00> : vector<8x896xf32>
    %57 = tpu.matmul %55, %56, %cst_42 {dimension_numbers = #tpu.dot_dimension_numbers<[1], [0], [0], [1], [0, 0, 1, 1], [], []>} : vector<8x256xf32>, vector<256x896xf32>, vector<8x896xf32> -> vector<8x896xf32>
    %c0_43 = arith.constant 0 : index
    %c0_44 = arith.constant 0 : index
    %58 = vector.load %arg14[%c0_43, %c0_44] : memref<1x896xf32, #tpu.memory_space<vmem>>, vector<1x896xf32>
    %59 = vector.broadcast %58 : vector<1x896xf32> to vector<8x896xf32>
    %60 = arith.addf %57, %59 : vector<8x896xf32>
    %61 = arith.negf %60 : vector<8x896xf32>
    %62 = math.exp %61 : vector<8x896xf32>
    %cst_45 = arith.constant 1.000000e+00 : f32
    %63 = vector.broadcast %cst_45 : f32 to vector<8x896xf32>
    %64 = arith.addf %63, %62 : vector<8x896xf32>
    %65 = arith.divf %63, %64 : vector<8x896xf32>
    %c0_46 = arith.constant 0 : index
    %c0_47 = arith.constant 0 : index
    %66 = vector.load %arg15[%c0_46, %c0_47] : memref<8x896xf32, #tpu.memory_space<vmem>>, vector<8x896xf32>
    tpu.vector_store %arg15[%c0_46, %c0_47], %65 {strides = array<i32>} : memref<8x896xf32, #tpu.memory_space<vmem>>, vector<8x896xf32>,
    return
  }
  func.func @transform_0(%arg0: i32) -> (i32, i32) {
    %c0_i32 = arith.constant 0 : i32
    %c0_i32_0 = arith.constant 0 : i32
    return %arg0, %c0_i32 : i32, i32
  }
  func.func @transform_1(%arg0: i32) -> (i32, i32) {
    %c0_i32 = arith.constant 0 : i32
    %c0_i32_0 = arith.constant 0 : i32
    return %arg0, %c0_i32 : i32, i32
  }
  func.func @transform_2(%arg0: i32) -> (i32, i32) {
    %c0_i32 = arith.constant 0 : i32
    %c0_i32_0 = arith.constant 0 : i32
    %c0_i32_1 = arith.constant 0 : i32
    return %c0_i32, %c0_i32_0 : i32, i32
  }
  func.func @transform_3(%arg0: i32) -> (i32, i32) {
    %c0_i32 = arith.constant 0 : i32
    %c0_i32_0 = arith.constant 0 : i32
    %c0_i32_1 = arith.constant 0 : i32
    return %c0_i32, %c0_i32_0 : i32, i32
  }
  func.func @transform_4(%arg0: i32) -> (i32, i32) {
    %c0_i32 = arith.constant 0 : i32
    %c0_i32_0 = arith.constant 0 : i32
    %c0_i32_1 = arith.constant 0 : i32
    return %c0_i32, %c0_i32_0 : i32, i32
  }
  func.func @transform_5(%arg0: i32) -> (i32, i32) {
    %c0_i32 = arith.constant 0 : i32
    %c0_i32_0 = arith.constant 0 : i32
    %c0_i32_1 = arith.constant 0 : i32
    return %c0_i32, %c0_i32_0 : i32, i32
  }
  func.func @transform_6(%arg0: i32) -> (i32, i32) {
    %c0_i32 = arith.constant 0 : i32
    %c0_i32_0 = arith.constant 0 : i32
    %c0_i32_1 = arith.constant 0 : i32
    return %c0_i32, %c0_i32_0 : i32, i32
  }
  func.func @transform_7(%arg0: i32) -> (i32, i32) {
    %c0_i32 = arith.constant 0 : i32
    %c0_i32_0 = arith.constant 0 : i32
    %c0_i32_1 = arith.constant 0 : i32
    return %c0_i32, %c0_i32_0 : i32, i32
  }
  func.func @transform_8(%arg0: i32) -> (i32, i32) {
    %c0_i32 = arith.constant 0 : i32
    %c0_i32_0 = arith.constant 0 : i32
    %c0_i32_1 = arith.constant 0 : i32
    return %c0_i32, %c0_i32_0 : i32, i32
  }
  func.func @transform_9(%arg0: i32) -> (i32, i32) {
    %c0_i32 = arith.constant 0 : i32
    %c0_i32_0 = arith.constant 0 : i32
    %c0_i32_1 = arith.constant 0 : i32
    return %c0_i32, %c0_i32_0 : i32, i32
  }
  func.func @transform_10(%arg0: i32) -> (i32, i32) {
    %c0_i32 = arith.constant 0 : i32
    %c0_i32_0 = arith.constant 0 : i32
    %c0_i32_1 = arith.constant 0 : i32
    return %c0_i32, %c0_i32_0 : i32, i32
  }
  func.func @transform_11(%arg0: i32) -> (i32, i32) {
    %c0_i32 = arith.constant 0 : i32
    %c0_i32_0 = arith.constant 0 : i32
    %c0_i32_1 = arith.constant 0 : i32
    return %c0_i32, %c0_i32_0 : i32, i32
  }
  func.func @transform_12(%arg0: i32) -> (i32, i32) {
    %c0_i32 = arith.constant 0 : i32
    %c0_i32_0 = arith.constant 0 : i32
    %c0_i32_1 = arith.constant 0 : i32
    return %c0_i32, %c0_i32_0 : i32, i32
  }
  func.func @transform_13(%arg0: i32) -> (i32, i32) {
    %c0_i32 = arith.constant 0 : i32
    %c0_i32_0 = arith.constant 0 : i32
    %c0_i32_1 = arith.constant 0 : i32
    return %c0_i32, %c0_i32_0 : i32, i32
  }
  func.func @transform_14(%arg0: i32) -> (i32, i32) {
    %c0_i32 = arith.constant 0 : i32
    %c0_i32_0 = arith.constant 0 : i32
    return %arg0, %c0_i32 : i32, i32
  }
  func.func @transform_15(%arg0: i32) -> (i32, i32) {
    %c0_i32 = arith.constant 0 : i32
    %c0_i32_0 = arith.constant 0 : i32
    return %arg0, %c0_i32 : i32, i32
  }
  func.func @transform_16(%arg0: i32) -> (i32, i32) {
    %c0_i32 = arith.constant 0 : i32
    %c0_i32_0 = arith.constant 0 : i32
    return %arg0, %c0_i32 : i32, i32
  }
}

</mosaic_0001>

<bundles_post_ra>
// kernel: tpu_custom_call.1
= control target key start
LH: loop header
LB: loop body
LE: loop exit
PB: predicated region body
PF: predicated region fallthrough
CT: control target
= control target key end

     0   :  { %s2330_s0 = inlined_call_operand.hbm [shape: f32[8,896], index: 0, kind: input, shape index: {}]   ;;  %s2331_s1 = inlined_call_operand.hbm [shape: f32[8,128], index: 1, kind: input, shape index: {}]   ;;  %s2332_s2 = inlined_call_operand.hbm [shape: f32[896,256], index: 2, kind: input, shape index: {}]   ;;  %s2333_s3 = inlined_call_operand.vmem [shape: f32[1,256], index: 3, kind: input, shape index: {}]   ;;  %s2334_s4 = inlined_call_operand.hbm [shape: f32[256,128], index: 4, kind: input, shape index: {}]   ;;  %s2335_s5 = inlined_call_operand.hbm [shape: f32[1,128], index: 5, kind: input, shape index: {}]   ;;  %s2336_s6 = inlined_call_operand.hbm [shape: f32[128,256], index: 6, kind: input, shape index: {}]   ;;  %s2337_s7 = inlined_call_operand.vmem [shape: f32[1,256], index: 7, kind: input, shape index: {}]   ;;  %s2338_s8 = inlined_call_operand.hbm [shape: f32[128,128], index: 8, kind: input, shape index: {}]   ;;  %s2339_s9 = inlined_call_operand.vmem [shape: f32[1,128], index: 9, kind: input, shape index: {}]   ;;  %s2340_s10 = inlined_call_operand.hbm [shape: f32[128,256], index: 10, kind: input, shape index: {}]   ;;  %s2341_s11 = inlined_call_operand.hbm [shape: f32[1,256], index: 11, kind: input, shape index: {}]   ;;  %s2342_s12 = inlined_call_operand.hbm [shape: f32[256,896], index: 12, kind: input, shape index: {}]   ;;  %s2343_s13 = inlined_call_operand.vmem [shape: f32[1,896], index: 13, kind: input, shape index: {}]   ;;  %s2344_s14 = inlined_call_operand.hbm [shape: f32[8,896], index: 14, kind: output, shape index: {0}]   ;;  %s2345_s15 = inlined_call_operand.hbm [shape: f32[8,128], index: 15, kind: output, shape index: {1}]   ;;  %s2346_s16 = inlined_call_operand.hbm [shape: f32[8,128], index: 16, kind: output, shape index: {2}]  }
   0x1   :  { %2348 = sst [smem:[#allocation31_spill]] %s2330_s0 }
   0x2   :  { %22 = vsyncpa [#allocation3], 0 }
   0x3   :  { %23 = vsyncpa [#allocation6], 0 }
   0x4   :  { %24 = vsyncpa [#allocation9], 0 }
   0x5   :  { %25 = vsyncpa [#allocation12], 0 }
   0x6   :  { %26 = vsyncpa [#allocation15], 0 }
   0x7   :  { %27 = vsyncpa [#allocation18], 0 }
   0x8   :  { %28 = vsyncpa [#allocation4], 0  ;;  %s46_s23 = sshll.u32 %s2331_s1, 4  ;;  %s47_s23 = int_to_ptr.hbm [resolvable:$true] %s46_s23 }
   0x9   :  { %29 = vsyncpa [#allocation21], 0  ;;  %s2114_s24 = smov [#allocation5]   ;;  %s71_s28 = sshll.u32 %s2334_s4, 4  ;;  %s72_s28 = int_to_ptr.hbm [resolvable:$true] %s71_s28 }
   0xa   :  { %s48_s25 = sshll.u32 %s2114_s24, 4  ;;  %s2115_s29 = smov [#allocation8]   ;;  %s49_s25 = int_to_ptr.vmem [resolvable:$true] %s48_s25 }
   0xb   :  { %51 = dma.hbm_to_vmem [thread:$0]  %s47_s23, 128, %s49_s25, [#allocation6]  }
   0xc   :  { %s73_s30 = sshll.u32 %s2115_s29, 4  ;;  %s2347_s0 = smov 128   ;;  %s74_s30 = int_to_ptr.vmem [resolvable:$true] %s73_s30 }
   0xd   :  { %s2117_s17 = smov 8   ;;  %s95_s19 = sshll.u32 %s2336_s6, 4  ;;  %s96_s19 = int_to_ptr.hbm [resolvable:$true] %s95_s19 }
   0xe   :  { %79 = dma.hbm_to_vmem [thread:$0]  %s72_s28, 4096, %s74_s30, [#allocation9], %s2347_s0, %s2347_s0, %s2117_s17  }
   0xf   :  { %s2118_s20 = smov [#allocation11]   ;;  %s125_s23 = sshll.u32 %s2340_s10, 4  ;;  %s126_s23 = int_to_ptr.hbm [resolvable:$true] %s125_s23 }
  0x10   :  { %s97_s21 = sshll.u32 %s2118_s20, 4  ;;  %s2119_s24 = smov 256   ;;  %s98_s21 = int_to_ptr.vmem [resolvable:$true] %s97_s21 }
  0x11   :  { %s2120_s25 = smov 16   ;;  %s2121_s26 = smov [#allocation14]  }
  0x12   :  { %103 = dma.hbm_to_vmem [thread:$0]  %s96_s19, 4096, %s98_s21, [#allocation12], %s2119_s24, %s2119_s24, %s2120_s25  }
  0x13   :  { %s127_s27 = sshll.u32 %s2121_s26, 4  ;;  %s2349_s30 = sld [smem:[#allocation31_spill]]  ;;  %s128_s27 = int_to_ptr.vmem [resolvable:$true] %s127_s27 }
  0x14   :  { %133 = dma.hbm_to_vmem [thread:$0]  %s126_s23, 4096, %s128_s27, [#allocation15], %s2119_s24, %s2119_s24, %s2120_s25  }
  0x15   :  { %s56_s18 = sshll.u32 %s2332_s2, 4  ;;  %s2122_s20 = smov [#allocation2]   ;;  %s57_s18 = int_to_ptr.hbm [resolvable:$true] %s56_s18 }
  0x16   :  { %s37_s4 = sshll.u32 %s2122_s20, 4  ;;  %s2123_s10 = smov [#allocation7]   ;;  %s38_s4 = int_to_ptr.vmem [resolvable:$true] %s37_s4 }
  0x17   :  { %s58_s19 = sshll.u32 %s2123_s10, 4  ;;  %s85_s26 = sshll.u32 %s2335_s5, 4  ;;  %s59_s19 = int_to_ptr.vmem [resolvable:$true] %s58_s19  ;;  %s86_s26 = int_to_ptr.hbm [resolvable:$true] %s85_s26 }
  0x18   :  { %64 = dma.hbm_to_vmem [thread:$0]  %s57_s18, 28672, %s59_s19, [#allocation6], %s2119_s24, %s2119_s24, %s2120_s25  }
  0x19   :  { %s35_s0 = sshll.u32 %s2349_s30, 4  ;;  %s110_s27 = sshll.u32 %s2338_s8, 4  ;;  %s36_s0 = int_to_ptr.hbm [resolvable:$true] %s35_s0  ;;  %s111_s27 = int_to_ptr.hbm [resolvable:$true] %s110_s27 }
  0x1a   :  { %40 = dma.hbm_to_vmem [thread:$0]  %s36_s0, 896, %s38_s4, [#allocation3]  }
  0x1b   :  { %s2124_s28 = smov [#allocation10]   ;;  %s2125_s30 = smov [#allocation13]  }
  0x1c   :  { %s87_s2 = sshll.u32 %s2124_s28, 4  ;;  %s112_s0 = sshll.u32 %s2125_s30, 4  ;;  %s88_s2 = int_to_ptr.vmem [resolvable:$true] %s87_s2  ;;  %s113_s0 = int_to_ptr.vmem [resolvable:$true] %s112_s0 }
  0x1d   :  { %90 = dma.hbm_to_vmem [thread:$0]  %s86_s26, 16, %s88_s2, [#allocation9]  }
  0x1e   :  { %s139_s20 = sshll.u32 %s2341_s11, 4  ;;  %s2350_s5 = smov 128   ;;  %s140_s20 = int_to_ptr.hbm [resolvable:$true] %s139_s20 }
  0x1f   :  { %118 = dma.hbm_to_vmem [thread:$0]  %s111_s27, 2048, %s113_s0, [#allocation12], %s2350_s5, %s2350_s5, %s2117_s17  }
  0x20   :  { %s149_s8 = sshll.u32 %s2342_s12, 4  ;;  %s2126_s18 = smov [#allocation16]   ;;  %s150_s8 = int_to_ptr.hbm [resolvable:$true] %s149_s8 }
  0x21   :  { %s141_s4 = sshll.u32 %s2126_s18, 4  ;;  %s2127_s10 = smov [#allocation17]   ;;  %s142_s4 = int_to_ptr.vmem [resolvable:$true] %s141_s4 }
  0x22   :  { %144 = dma.hbm_to_vmem [thread:$0]  %s140_s20, 32, %s142_s4, [#allocation15]  }
  0x23   :  { %s151_s19 = sshll.u32 %s2127_s10, 4  ;;  %s2128_s21 = smov 896   ;;  %s152_s19 = int_to_ptr.vmem [resolvable:$true] %s151_s19 }
  0x24   :  { %s2129_s11 = smov 56  }
  0x25   :  { %157 = dma.hbm_to_vmem [thread:$0]  %s150_s8, 28672, %s152_s19, [#allocation18], %s2128_s21, %s2128_s21, %s2129_s11  }
  0x26   :  { %2098 = dma.done.wait [#allocation3], 896  }
  0x27   :  { %2099 = vsyncadd [#allocation3], 4294966400 }
  0x28   :  { %2100 = dma.done.wait [#allocation6], 28800  }
  0x29   :  { %2101 = vsyncadd [#allocation6], 4294938496 }
  0x2a   :  { %2102 = dma.done.wait [#allocation9], 4112  }
  0x2b   :  { %2103 = vsyncadd [#allocation9], 4294963184 }
  0x2c   :  { %2104 = dma.done.wait [#allocation12], 6144  }
  0x2d   :  { %2105 = vsyncadd [#allocation12], 4294961152 }
  0x2e   :  { %2106 = dma.done.wait [#allocation15], 4128  }
  0x2f   :  { %2107 = vsyncadd [#allocation15], 4294963168 }
  0x30   :  { %2108 = dma.done.wait [#allocation18], 28672  }
  0x31   :  { %2109 = vsyncadd [#allocation18], 4294938624  ;;  %v237_v0 = vld [vmem:[#allocation7 + $0xf0] sm:$0xff]  ;;  %v235_v1 = vld [vmem:[#allocation7 + $0xe0] sm:$0xff]  ;;  %s1693_s28 = sshll.u32 %s2345_s15, 4  ;;  %s2131_s2 = smov [#allocation22]   ;;  %s1694_s28 = int_to_ptr.hbm [resolvable:$true] %s1693_s28 }
  0x32   :  { %v269_v2 = vld [vmem:[#allocation7 + $0x1f0] sm:$0xff]  ;;  %437 = vmatpush.msra.mxu0 %v237_v0  ;;  %v267_v3 = vld [vmem:[#allocation7 + $0x1e0] sm:$0xff]  ;;  %s1702_s30 = sshll.u32 %s2131_s2, 4  ;;  %s1704_s1 = sshll.u32 %s2346_s16, 4  ;;  %s1703_s30 = int_to_ptr.vmem [resolvable:$true] %s1702_s30  ;;  %s1705_s1 = int_to_ptr.hbm [resolvable:$true] %s1704_s1 }
  0x33   :  { %457 = vmatpush.msra.mxu1 %v269_v2  ;;  %v301_v4 = vld [vmem:[#allocation7 + $0x2f0] sm:$0xff]  ;;  %v299_v7 = vld [vmem:[#allocation7 + $0x2e0] sm:$0xff]  ;;  %s1682_s25 = sshll.u32 %s2344_s14, 4  ;;  %s1683_s25 = int_to_ptr.hbm [resolvable:$true] %s1682_s25 }
  0x34   :  { %v233_v5 = vld [vmem:[#allocation7 + $0xd0] sm:$0xff]  ;;  %477 = vmatpush.msra.mxu2 %v301_v4  ;;  %438 = vmatpush.msra.mxu0 %v235_v1  ;;  %v231_v9 = vld [vmem:[#allocation7 + $0xc0] sm:$0xff] }
  0x35   :  { %v265_v6 = vld [vmem:[#allocation7 + $0x1d0] sm:$0xff]  ;;  %458 = vmatpush.msra.mxu1 %v267_v3  ;;  %v263_v10 = vld [vmem:[#allocation7 + $0x1c0] sm:$0xff] }
  0x36   :  { %v297_v8 = vld [vmem:[#allocation7 + $0x2d0] sm:$0xff]  ;;  %478 = vmatpush.msra.mxu2 %v299_v7  ;;  %439 = vmatpush.msra.mxu0 %v233_v5  ;;  %v295_v11 = vld [vmem:[#allocation7 + $0x2c0] sm:$0xff] }
  0x37   :  { %459 = vmatpush.msra.mxu1 %v265_v6  ;;  %v229_v12 = vld [vmem:[#allocation7 + $0xb0] sm:$0xff]  ;;  %v227_v15 = vld [vmem:[#allocation7 + $0xa0] sm:$0xff] }
  0x38   :  { %479 = vmatpush.msra.mxu2 %v297_v8  ;;  %v261_v13 = vld [vmem:[#allocation7 + $0x1b0] sm:$0xff]  ;;  %440 = vmatpush.msra.mxu0 %v231_v9  ;;  %v259_v16 = vld [vmem:[#allocation7 + $0x1a0] sm:$0xff] }
  0x39   :  { %460 = vmatpush.msra.mxu1 %v263_v10  ;;  %v293_v14 = vld [vmem:[#allocation7 + $0x2b0] sm:$0xff]  ;;  %v291_v17 = vld [vmem:[#allocation7 + $0x2a0] sm:$0xff] }
  0x3a   :  { %480 = vmatpush.msra.mxu2 %v295_v11  ;;  %441 = vmatpush.msra.mxu0 %v229_v12  ;;  %v225_v18 = vld [vmem:[#allocation7 + $0x90] sm:$0xff]  ;;  %v223_v22 = vld [vmem:[#allocation7 + $0x80] sm:$0xff] }
  0x3b   :  { %461 = vmatpush.msra.mxu1 %v261_v13  ;;  %v257_v19 = vld [vmem:[#allocation7 + $0x190] sm:$0xff]  ;;  %v255_v23 = vld [vmem:[#allocation7 + $0x180] sm:$0xff] }
  0x3c   :  { %481 = vmatpush.msra.mxu2 %v293_v14  ;;  %442 = vmatpush.msra.mxu0 %v227_v15  ;;  %v289_v20 = vld [vmem:[#allocation7 + $0x290] sm:$0xff]  ;;  %v331_v24 = vld [vmem:[#allocation7 + $0x3e0] sm:$0xff] }
  0x3d   :  { %462 = vmatpush.msra.mxu1 %v259_v16  ;;  %v333_v21 = vld [vmem:[#allocation7 + $0x3f0] sm:$0xff]  ;;  %v287_v25 = vld [vmem:[#allocation7 + $0x280] sm:$0xff] }
  0x3e   :  { %482 = vmatpush.msra.mxu2 %v291_v17  ;;  %497 = vmatpush.msra.mxu3 %v333_v21  ;;  %v329_v26 = vld [vmem:[#allocation7 + $0x3d0] sm:$0xff]  ;;  %v327_v30 = vld [vmem:[#allocation7 + $0x3c0] sm:$0xff] }
  0x3f   :  { %443 = vmatpush.msra.mxu0 %v225_v18  ;;  %463 = vmatpush.msra.mxu1 %v257_v19  ;;  %v221_v27 = vld [vmem:[#allocation7 + $0x70] sm:$0xff]  ;;  %v219_v31 = vld [vmem:[#allocation7 + $0x60] sm:$0xff] }
  0x40   :  { %483 = vmatpush.msra.mxu2 %v289_v20  ;;  %v253_v28 = vld [vmem:[#allocation7 + $0x170] sm:$0xff]  ;;  %498 = vmatpush.msra.mxu3 %v331_v24  ;;  %v251_v32 = vld [vmem:[#allocation7 + $0x160] sm:$0xff]  ;;  %v238_v20 = vld [vmem:[#allocation7 + $0xf8] sm:$0xff] }
  0x41   :  { %444 = vmatpush.msra.mxu0 %v223_v22  ;;  %464 = vmatpush.msra.mxu1 %v255_v23  ;;  %v285_v29 = vld [vmem:[#allocation7 + $0x270] sm:$0xff]  ;;  %v283_v33 = vld [vmem:[#allocation7 + $0x260] sm:$0xff]  ;;  %v236_v24 = vld [vmem:[#allocation7 + $0xe8] sm:$0xff] }
  0x42   :  { %484 = vmatpush.msra.mxu2 %v287_v25  ;;  %499 = vmatpush.msra.mxu3 %v329_v26  ;;  %v325_v34 = vld [vmem:[#allocation7 + $0x3b0] sm:$0xff]  ;;  %v323_v38 = vld [vmem:[#allocation7 + $0x3a0] sm:$0xff] }
  0x43   :  { %445 = vmatpush.msra.mxu0 %v221_v27  ;;  %465 = vmatpush.msra.mxu1 %v253_v28  ;;  %v217_v35 = vld [vmem:[#allocation7 + $0x50] sm:$0xff]  ;;  %v215_v39 = vld [vmem:[#allocation7 + $0x40] sm:$0xff]  ;;  %v234_v28 = vld [vmem:[#allocation7 + $0xd8] sm:$0xff] }
  0x44   :  { %485 = vmatpush.msra.mxu2 %v285_v29  ;;  %v249_v36 = vld [vmem:[#allocation7 + $0x150] sm:$0xff]  ;;  %500 = vmatpush.msra.mxu3 %v327_v30  ;;  %v247_v40 = vld [vmem:[#allocation7 + $0x140] sm:$0xff] }
  0x45   :  { %446 = vmatpush.msra.mxu0 %v219_v31  ;;  %466 = vmatpush.msra.mxu1 %v251_v32  ;;  %v281_v37 = vld [vmem:[#allocation7 + $0x250] sm:$0xff]  ;;  %v279_v41 = vld [vmem:[#allocation7 + $0x240] sm:$0xff] }
  0x46   :  { %486 = vmatpush.msra.mxu2 %v283_v33  ;;  %501 = vmatpush.msra.mxu3 %v325_v34  ;;  %v321_v42 = vld [vmem:[#allocation7 + $0x390] sm:$0xff]  ;;  %v319_v46 = vld [vmem:[#allocation7 + $0x380] sm:$0xff] }
  0x47   :  { %447 = vmatpush.msra.mxu0 %v217_v35  ;;  %467 = vmatpush.msra.mxu1 %v249_v36  ;;  %v213_v43 = vld [vmem:[#allocation7 + $0x30] sm:$0xff]  ;;  %v211_v47 = vld [vmem:[#allocation7 + $0x20] sm:$0xff]  ;;  %v2256_v36 = vld [vmem:[#allocation2 + $0x18] sm:$0xff] }
  0x48   :  { %487 = vmatpush.msra.mxu2 %v281_v37  ;;  %v245_v44 = vld [vmem:[#allocation7 + $0x130] sm:$0xff]  ;;  %502 = vmatpush.msra.mxu3 %v323_v38  ;;  %v243_v48 = vld [vmem:[#allocation7 + $0x120] sm:$0xff] }
  0x49   :  { %448 = vmatpush.msra.mxu0 %v215_v39  ;;  %468 = vmatpush.msra.mxu1 %v247_v40  ;;  %v277_v45 = vld [vmem:[#allocation7 + $0x230] sm:$0xff]  ;;  %v275_v49 = vld [vmem:[#allocation7 + $0x220] sm:$0xff]  ;;  %v232_v40 = vld [vmem:[#allocation7 + $0xc8] sm:$0xff] }
  0x4a   :  { %488 = vmatpush.msra.mxu2 %v279_v41  ;;  %503 = vmatpush.msra.mxu3 %v321_v42  ;;  %v317_v50 = vld [vmem:[#allocation7 + $0x370] sm:$0xff]  ;;  %v315_v54 = vld [vmem:[#allocation7 + $0x360] sm:$0xff] }
  0x4b   :  { %449 = vmatpush.msra.mxu0 %v213_v43  ;;  %469 = vmatpush.msra.mxu1 %v245_v44  ;;  %v209_v51 = vld [vmem:[#allocation7 + $0x10] sm:$0xff]  ;;  %v207_v55 = vld [vmem:[#allocation7] sm:$0xff]  ;;  %v2260_v44 = vld [vmem:[#allocation2 + $0x8] sm:$0xff] }
  0x4c   :  { %489 = vmatpush.msra.mxu2 %v277_v45  ;;  %v241_v52 = vld [vmem:[#allocation7 + $0x110] sm:$0xff]  ;;  %504 = vmatpush.msra.mxu3 %v319_v46  ;;  %v239_v56 = vld [vmem:[#allocation7 + $0x100] sm:$0xff] }
  0x4d   :  { %450 = vmatpush.msra.mxu0 %v211_v47  ;;  %470 = vmatpush.msra.mxu1 %v243_v48  ;;  %v273_v53 = vld [vmem:[#allocation7 + $0x210] sm:$0xff]  ;;  %v271_v59 = vld [vmem:[#allocation7 + $0x200] sm:$0xff] }
  0x4e   :  { %490 = vmatpush.msra.mxu2 %v275_v49  ;;  %505 = vmatpush.msra.mxu3 %v317_v50  ;;  %v365_v57 = vld [vmem:[#allocation7 + $0x4f0] sm:$0xff]  ;;  %v363_v61 = vld [vmem:[#allocation7 + $0x4e0] sm:$0xff]  ;;  %v230_v50 = vld [vmem:[#allocation7 + $0xb8] sm:$0xff] }
  0x4f   :  { %451 = vmatpush.msra.mxu0 %v209_v51  ;;  %471 = vmatpush.msra.mxu1 %v241_v52  ;;  %v397_v58 = vld [vmem:[#allocation7 + $0x5f0] sm:$0xff]  ;;  %v395_v62 = vld [vmem:[#allocation7 + $0x5e0] sm:$0xff] }
  0x50   :  { %491 = vmatpush.msra.mxu2 %v273_v53  ;;  %506 = vmatpush.msra.mxu3 %v315_v54  ;;  %v313_v60 = vld [vmem:[#allocation7 + $0x350] sm:$0xff]  ;;  %v311_v0 = vld [vmem:[#allocation7 + $0x340] sm:$0xff]  ;;  %v228_v54 = vld [vmem:[#allocation7 + $0xa8] sm:$0xff] }
  0x51   :  { %452 = vmatpush.msra.mxu0 %v207_v55  ;;  %472 = vmatpush.msra.mxu1 %v239_v56  ;;  %v429_v63 = vld [vmem:[#allocation7 + $0x6f0] sm:$0xff]  ;;  %v427_v3 = vld [vmem:[#allocation7 + $0x6e0] sm:$0xff]  ;;  %v270_v55 = vld [vmem:[#allocation7 + $0x1f8] sm:$0xff] }
  0x52   :  { %492 = vmatpush.msra.mxu2 %v271_v59  ;;  %v361_v1 = vld [vmem:[#allocation7 + $0x4d0] sm:$0xff]  ;;  %507 = vmatpush.msra.mxu3 %v313_v60  ;;  %v359_v5 = vld [vmem:[#allocation7 + $0x4c0] sm:$0xff]  ;;  %v268_v59 = vld [vmem:[#allocation7 + $0x1e8] sm:$0xff] }
  0x53   :  { %517 = vmatpush.msrb.mxu0 %v365_v57  ;;  %537 = vmatpush.msrb.mxu1 %v397_v58  ;;  %v393_v2 = vld [vmem:[#allocation7 + $0x5d0] sm:$0xff]  ;;  %v391_v6 = vld [vmem:[#allocation7 + $0x5c0] sm:$0xff]  ;;  %v302_v58 = vld [vmem:[#allocation7 + $0x2f8] sm:$0xff] }
  0x54   :  { %v309_v4 = vld [vmem:[#allocation7 + $0x330] sm:$0xff]  ;;  %557 = vmatpush.msrb.mxu2 %v429_v63  ;;  %508 = vmatpush.msra.mxu3 %v311_v0  ;;  %v307_v8 = vld [vmem:[#allocation7 + $0x320] sm:$0xff]  ;;  %v226_v60 = vld [vmem:[#allocation7 + $0x98] sm:$0xff] }
  0x55   :  { %518 = vmatpush.msrb.mxu0 %v363_v61  ;;  %538 = vmatpush.msrb.mxu1 %v395_v62  ;;  %v425_v7 = vld [vmem:[#allocation7 + $0x6d0] sm:$0xff]  ;;  %v423_v11 = vld [vmem:[#allocation7 + $0x6c0] sm:$0xff]  ;;  %v300_v62 = vld [vmem:[#allocation7 + $0x2e8] sm:$0xff] }
  0x56   :  { %558 = vmatpush.msrb.mxu2 %v427_v3  ;;  %v357_v9 = vld [vmem:[#allocation7 + $0x4b0] sm:$0xff]  ;;  %509 = vmatpush.msra.mxu3 %v309_v4  ;;  %v355_v13 = vld [vmem:[#allocation7 + $0x4a0] sm:$0xff]  ;;  %v266_v0 = vld [vmem:[#allocation7 + $0x1d8] sm:$0xff] }
  0x57   :  { %519 = vmatpush.msrb.mxu0 %v361_v1  ;;  %539 = vmatpush.msrb.mxu1 %v393_v2  ;;  %v389_v10 = vld [vmem:[#allocation7 + $0x5b0] sm:$0xff]  ;;  %v387_v14 = vld [vmem:[#allocation7 + $0x5a0] sm:$0xff]  ;;  %v224_v2 = vld [vmem:[#allocation7 + $0x88] sm:$0xff] }
  0x58   :  { %v305_v12 = vld [vmem:[#allocation7 + $0x310] sm:$0xff]  ;;  %559 = vmatpush.msrb.mxu2 %v425_v7  ;;  %510 = vmatpush.msra.mxu3 %v307_v8  ;;  %v303_v16 = vld [vmem:[#allocation7 + $0x300] sm:$0xff]  ;;  %v264_v3 = vld [vmem:[#allocation7 + $0x1c8] sm:$0xff] }
  0x59   :  { %520 = vmatpush.msrb.mxu0 %v359_v5  ;;  %540 = vmatpush.msrb.mxu1 %v391_v6  ;;  %v421_v15 = vld [vmem:[#allocation7 + $0x6b0] sm:$0xff]  ;;  %v419_v19 = vld [vmem:[#allocation7 + $0x6a0] sm:$0xff]  ;;  %v298_v4 = vld [vmem:[#allocation7 + $0x2d8] sm:$0xff] }
  0x5a   :  { %560 = vmatpush.msrb.mxu2 %v423_v11  ;;  %v353_v17 = vld [vmem:[#allocation7 + $0x490] sm:$0xff]  ;;  %511 = vmatpush.msra.mxu3 %v305_v12  ;;  %v351_v21 = vld [vmem:[#allocation7 + $0x480] sm:$0xff]  ;;  %v2271_v5 = vld [vmem:[#allocation2 + $0x28] sm:$0xff] }
  0x5b   :  { %521 = vmatpush.msrb.mxu0 %v357_v9  ;;  %541 = vmatpush.msrb.mxu1 %v389_v10  ;;  %v385_v18 = vld [vmem:[#allocation7 + $0x590] sm:$0xff]  ;;  %v383_v22 = vld [vmem:[#allocation7 + $0x580] sm:$0xff]  ;;  %v222_v6 = vld [vmem:[#allocation7 + $0x78] sm:$0xff] }
  0x5c   :  { %561 = vmatpush.msrb.mxu2 %v421_v15  ;;  %512 = vmatpush.msra.mxu3 %v303_v16  ;;  %v417_v23 = vld [vmem:[#allocation7 + $0x690] sm:$0xff]  ;;  %v415_v27 = vld [vmem:[#allocation7 + $0x680] sm:$0xff]  ;;  %v262_v7 = vld [vmem:[#allocation7 + $0x1b8] sm:$0xff] }
  0x5d   :  { %522 = vmatpush.msrb.mxu0 %v355_v13  ;;  %542 = vmatpush.msrb.mxu1 %v387_v14  ;;  %v349_v25 = vld [vmem:[#allocation7 + $0x470] sm:$0xff]  ;;  %v347_v29 = vld [vmem:[#allocation7 + $0x460] sm:$0xff]  ;;  %v296_v8 = vld [vmem:[#allocation7 + $0x2c8] sm:$0xff] }
  0x5e   :  { %562 = vmatpush.msrb.mxu2 %v419_v19  ;;  %v381_v26 = vld [vmem:[#allocation7 + $0x570] sm:$0xff]  ;;  %577 = vmatpush.msrb.mxu3 %v238_v20  ;;  %v379_v30 = vld [vmem:[#allocation7 + $0x560] sm:$0xff]  ;;  %v220_v9 = vld [vmem:[#allocation7 + $0x68] sm:$0xff] }
  0x5f   :  { %523 = vmatpush.msrb.mxu0 %v353_v17  ;;  %543 = vmatpush.msrb.mxu1 %v385_v18  ;;  %v413_v31 = vld [vmem:[#allocation7 + $0x670] sm:$0xff]  ;;  %v2254_v32 = vld [vmem:[#allocation2] sm:$0xff]  ;;  %v334_v10 = vld [vmem:[#allocation7 + $0x3f8] sm:$0xff] }
  0x60   :  { %563 = vmatpush.msrb.mxu2 %v417_v23  ;;  %578 = vmatpush.msrb.mxu3 %v236_v24  ;;  %v345_v33 = vld [vmem:[#allocation7 + $0x450] sm:$0xff]  ;;  %v411_v35 = vld [vmem:[#allocation7 + $0x660] sm:$0xff]  ;;  %v260_v11 = vld [vmem:[#allocation7 + $0x1a8] sm:$0xff] }
  0x61   :  { %524 = vmatpush.msrb.mxu0 %v351_v21  ;;  %544 = vmatpush.msrb.mxu1 %v383_v22  ;;  %v377_v34 = vld [vmem:[#allocation7 + $0x550] sm:$0xff]  ;;  %v343_v37 = vld [vmem:[#allocation7 + $0x440] sm:$0xff]  ;;  %v294_v12 = vld [vmem:[#allocation7 + $0x2b8] sm:$0xff] }
  0x62   :  { %564 = vmatpush.msrb.mxu2 %v415_v27  ;;  %579 = vmatpush.msrb.mxu3 %v234_v28  ;;  %v375_v38 = vld [vmem:[#allocation7 + $0x540] sm:$0xff]  ;;  %v409_v39 = vld [vmem:[#allocation7 + $0x650] sm:$0xff]  ;;  %v218_v13 = vld [vmem:[#allocation7 + $0x58] sm:$0xff] }
  0x63   :  { %525 = vmatpush.msrb.mxu0 %v349_v25  ;;  %545 = vmatpush.msrb.mxu1 %v381_v26  ;;  %v341_v41 = vld [vmem:[#allocation7 + $0x430] sm:$0xff]  ;;  %v407_v43 = vld [vmem:[#allocation7 + $0x640] sm:$0xff]  ;;  %v332_v14 = vld [vmem:[#allocation7 + $0x3e8] sm:$0xff] }
  0x64   :  { %565 = vmatpush.msrb.mxu2 %v413_v31  ;;  %453 = vmatmul.f32.vlgmr.msra.gmra.mxu0 %v2254_v32  ;;  %v373_v42 = vld [vmem:[#allocation7 + $0x530] sm:$0xff]  ;;  %v339_v45 = vld [vmem:[#allocation7 + $0x420] sm:$0xff]  ;;  %v258_v15 = vld [vmem:[#allocation7 + $0x198] sm:$0xff] }
  0x65   :  { %526 = vmatpush.msrb.mxu0 %v347_v29  ;;  %546 = vmatpush.msrb.mxu1 %v379_v30  ;;  %v2262_v46 = vld [vmem:[#allocation2 + $0x10] sm:$0xff]  ;;  %v371_v47 = vld [vmem:[#allocation7 + $0x520] sm:$0xff]  ;;  %v292_v16 = vld [vmem:[#allocation7 + $0x2a8] sm:$0xff] }
  0x66   :  { %566 = vmatpush.msrb.mxu2 %v411_v35  ;;  %513 = vmatmul.f32.vlgmr.msra.gmra.mxu3 %v2256_v36  ;;  %v405_v48 = vld [vmem:[#allocation7 + $0x630] sm:$0xff]  ;;  %v403_v52 = vld [vmem:[#allocation7 + $0x620] sm:$0xff]  ;;  %v216_v17 = vld [vmem:[#allocation7 + $0x48] sm:$0xff] }
  0x67   :  { %527 = vmatpush.msrb.mxu0 %v345_v33  ;;  %547 = vmatpush.msrb.mxu1 %v377_v34  ;;  %v337_v49 = vld [vmem:[#allocation7 + $0x410] sm:$0xff]  ;;  %v335_v53 = vld [vmem:[#allocation7 + $0x400] sm:$0xff]  ;;  %v330_v18 = vld [vmem:[#allocation7 + $0x3d8] sm:$0xff] }
  0x68   :  { %567 = vmatpush.msrb.mxu2 %v409_v39  ;;  %580 = vmatpush.msrb.mxu3 %v232_v40  ;;  %v369_v51 = vld [vmem:[#allocation7 + $0x510] sm:$0xff]  ;;  %v367_v56 = vld [vmem:[#allocation7 + $0x500] sm:$0xff]  ;;  %v256_v19 = vld [vmem:[#allocation7 + $0x188] sm:$0xff] }
  0x69   :  { %528 = vmatpush.msrb.mxu0 %v343_v37  ;;  %548 = vmatpush.msrb.mxu1 %v375_v38  ;;  %v401_v57 = vld [vmem:[#allocation7 + $0x610] sm:$0xff]  ;;  %v399_v61 = vld [vmem:[#allocation7 + $0x600] sm:$0xff]  ;;  %v290_v20 = vld [vmem:[#allocation7 + $0x298] sm:$0xff] }
  0x6a   :  { %568 = vmatpush.msrb.mxu2 %v407_v43  ;;  %473 = vmatmul.f32.vlgmr.msra.gmra.mxu1 %v2260_v44  ;;  %v2266_v63 = vld [vmem:[#allocation2 + $0x30] sm:$0xff]  ;;  %v2268_v1 = vld [vmem:[#allocation2 + $0x20] sm:$0xff]  ;;  %v214_v21 = vld [vmem:[#allocation7 + $0x38] sm:$0xff] }
  0x6b   :  { %529 = vmatpush.msrb.mxu0 %v341_v41  ;;  %549 = vmatpush.msrb.mxu1 %v373_v42  ;;  %v328_v22 = vld [vmem:[#allocation7 + $0x3c8] sm:$0xff]  ;;  %v254_v23 = vld [vmem:[#allocation7 + $0x178] sm:$0xff] }
  0x6c   :  { %493 = vmatmul.f32.vlgmr.msra.gmra.mxu2 %v2262_v46  ;;  %581 = vmatpush.msrb.mxu3 %v230_v50  ;;  %v288_v24 = vld [vmem:[#allocation7 + $0x288] sm:$0xff]  ;;  %v326_v26 = vld [vmem:[#allocation7 + $0x3b8] sm:$0xff] }
  0x6d   :  { %530 = vmatpush.msrb.mxu0 %v339_v45  ;;  %550 = vmatpush.msrb.mxu1 %v371_v47  ;;  %v212_v25 = vld [vmem:[#allocation7 + $0x28] sm:$0xff]  ;;  %v286_v28 = vld [vmem:[#allocation7 + $0x278] sm:$0xff] }
  0x6e   :  { %569 = vmatpush.msrb.mxu2 %v405_v48  ;;  %582 = vmatpush.msrb.mxu3 %v228_v54  ;;  %v252_v27 = vld [vmem:[#allocation7 + $0x168] sm:$0xff]  ;;  %v210_v29 = vld [vmem:[#allocation7 + $0x18] sm:$0xff] }
  0x6f   :  { %531 = vmatpush.msrb.mxu0 %v337_v49  ;;  %551 = vmatpush.msrb.mxu1 %v369_v51  ;;  %v324_v30 = vld [vmem:[#allocation7 + $0x3a8] sm:$0xff]  ;;  %v250_v31 = vld [vmem:[#allocation7 + $0x158] sm:$0xff] }
  0x70   :  { %570 = vmatpush.msrb.mxu2 %v403_v52  ;;  %583 = vmatpush.msrb.mxu3 %v226_v60  ;;  %v284_v33 = vld [vmem:[#allocation7 + $0x268] sm:$0xff]  ;;  %v322_v35 = vld [vmem:[#allocation7 + $0x398] sm:$0xff] }
  0x71   :  { %532 = vmatpush.msrb.mxu0 %v335_v53  ;;  %552 = vmatpush.msrb.mxu1 %v367_v56  ;;  %v208_v34 = vld [vmem:[#allocation7 + $0x8] sm:$0xff]  ;;  %v282_v38 = vld [vmem:[#allocation7 + $0x258] sm:$0xff] }
  0x72   :  { %571 = vmatpush.msrb.mxu2 %v401_v57  ;;  %533 = vmatmul.f32.vlgmr.msrb.gmra.mxu0 %v2268_v1  ;;  %v248_v37 = vld [vmem:[#allocation7 + $0x148] sm:$0xff]  ;;  %v366_v39 = vld [vmem:[#allocation7 + $0x4f8] sm:$0xff] }
  0x73   :  { %597 = vmatpush.msra.mxu0 %v270_v55  ;;  %617 = vmatpush.msra.mxu1 %v302_v58  ;;  %v320_v40 = vld [vmem:[#allocation7 + $0x388] sm:$0xff]  ;;  %v246_v41 = vld [vmem:[#allocation7 + $0x138] sm:$0xff] }
  0x74   :  { %572 = vmatpush.msrb.mxu2 %v399_v61  ;;  %584 = vmatpush.msrb.mxu3 %v224_v2  ;;  %v280_v42 = vld [vmem:[#allocation7 + $0x248] sm:$0xff]  ;;  %v318_v45 = vld [vmem:[#allocation7 + $0x378] sm:$0xff] }
  0x75   :  { %598 = vmatpush.msra.mxu0 %v268_v59  ;;  %618 = vmatpush.msra.mxu1 %v300_v62  ;;  %v364_v43 = vld [vmem:[#allocation7 + $0x4e8] sm:$0xff]  ;;  %v278_v48 = vld [vmem:[#allocation7 + $0x238] sm:$0xff] }
  0x76   :  { %573 = vmatmul.f32.vlgmr.msrb.gmra.mxu2 %v2266_v63  ;;  %553 = vmatmul.f32.vlgmr.msrb.gmra.mxu1 %v2271_v5  ;;  %v244_v47 = vld [vmem:[#allocation7 + $0x128] sm:$0xff]  ;;  %v362_v49 = vld [vmem:[#allocation7 + $0x4d8] sm:$0xff] }
  0x77   :  { %599 = vmatpush.msra.mxu0 %v266_v0  ;;  %619 = vmatpush.msra.mxu1 %v298_v4  ;;  %v316_v50 = vld [vmem:[#allocation7 + $0x368] sm:$0xff]  ;;  %v242_v51 = vld [vmem:[#allocation7 + $0x118] sm:$0xff] }
  0x78   :  { %585 = vmatpush.msrb.mxu3 %v222_v6  ;;  %637 = vmatpush.msra.mxu2 %v334_v10  ;;  %v276_v52 = vld [vmem:[#allocation7 + $0x228] sm:$0xff]  ;;  %v314_v54 = vld [vmem:[#allocation7 + $0x358] sm:$0xff] }
  0x79   :  { %600 = vmatpush.msra.mxu0 %v264_v3  ;;  %620 = vmatpush.msra.mxu1 %v296_v8  ;;  %v360_v53 = vld [vmem:[#allocation7 + $0x4c8] sm:$0xff]  ;;  %v274_v56 = vld [vmem:[#allocation7 + $0x218] sm:$0xff] }
  0x7a   :  { %586 = vmatpush.msrb.mxu3 %v220_v9  ;;  %638 = vmatpush.msra.mxu2 %v332_v14  ;;  %v240_v55 = vld [vmem:[#allocation7 + $0x108] sm:$0xff]  ;;  %v358_v57 = vld [vmem:[#allocation7 + $0x4b8] sm:$0xff] }
  0x7b   :  { %601 = vmatpush.msra.mxu0 %v262_v7  ;;  %621 = vmatpush.msra.mxu1 %v294_v12  ;;  %v398_v58 = vld [vmem:[#allocation7 + $0x5f8] sm:$0xff]  ;;  %v272_v59 = vld [vmem:[#allocation7 + $0x208] sm:$0xff] }
  0x7c   :  { %587 = vmatpush.msrb.mxu3 %v218_v13  ;;  %639 = vmatpush.msra.mxu2 %v330_v18  ;;  %v312_v60 = vld [vmem:[#allocation7 + $0x348] sm:$0xff]  ;;  %v430_v0 = vld [vmem:[#allocation7 + $0x6f8] sm:$0xff] }
  0x7d   :  { %602 = vmatpush.msra.mxu0 %v260_v11  ;;  %622 = vmatpush.msra.mxu1 %v292_v16  ;;  %v356_v61 = vld [vmem:[#allocation7 + $0x4a8] sm:$0xff]  ;;  %v310_v2 = vld [vmem:[#allocation7 + $0x338] sm:$0xff] }
  0x7e   :  { %588 = vmatpush.msrb.mxu3 %v216_v17  ;;  %640 = vmatpush.msra.mxu2 %v328_v22  ;;  %v396_v62 = vld [vmem:[#allocation7 + $0x5e8] sm:$0xff]  ;;  %v354_v3 = vld [vmem:[#allocation7 + $0x498] sm:$0xff] }
  0x7f   :  { %603 = vmatpush.msra.mxu0 %v258_v15  ;;  %623 = vmatpush.msra.mxu1 %v290_v20  ;;  %v394_v4 = vld [vmem:[#allocation7 + $0x5d8] sm:$0xff]  ;;  %v428_v6 = vld [vmem:[#allocation7 + $0x6e8] sm:$0xff] }
  0x80   :  { %589 = vmatpush.msrb.mxu3 %v214_v21  ;;  %641 = vmatpush.msra.mxu2 %v326_v26  ;;  %v352_v7 = vld [vmem:[#allocation7 + $0x488] sm:$0xff]  ;;  %v426_v9 = vld [vmem:[#allocation7 + $0x6d8] sm:$0xff] }
  0x81   :  { %604 = vmatpush.msra.mxu0 %v256_v19  ;;  %624 = vmatpush.msra.mxu1 %v288_v24  ;;  %v392_v8 = vld [vmem:[#allocation7 + $0x5c8] sm:$0xff]  ;;  %v350_v11 = vld [vmem:[#allocation7 + $0x478] sm:$0xff] }
  0x82   :  { %590 = vmatpush.msrb.mxu3 %v212_v25  ;;  %642 = vmatpush.msra.mxu2 %v324_v30  ;;  %v308_v10 = vld [vmem:[#allocation7 + $0x328] sm:$0xff]  ;;  %v390_v12 = vld [vmem:[#allocation7 + $0x5b8] sm:$0xff] }
  0x83   :  { %605 = vmatpush.msra.mxu0 %v254_v23  ;;  %625 = vmatpush.msra.mxu1 %v286_v28  ;;  %v424_v13 = vld [vmem:[#allocation7 + $0x6c8] sm:$0xff]  ;;  %v306_v14 = vld [vmem:[#allocation7 + $0x318] sm:$0xff] }
  0x84   :  { %591 = vmatpush.msrb.mxu3 %v210_v29  ;;  %643 = vmatpush.msra.mxu2 %v322_v35  ;;  %v348_v15 = vld [vmem:[#allocation7 + $0x468] sm:$0xff]  ;;  %v422_v17 = vld [vmem:[#allocation7 + $0x6b8] sm:$0xff] }
  0x85   :  { %606 = vmatpush.msra.mxu0 %v252_v27  ;;  %626 = vmatpush.msra.mxu1 %v284_v33  ;;  %v388_v16 = vld [vmem:[#allocation7 + $0x5a8] sm:$0xff]  ;;  %v346_v19 = vld [vmem:[#allocation7 + $0x458] sm:$0xff] }
  0x86   :  { %592 = vmatpush.msrb.mxu3 %v208_v34  ;;  %644 = vmatpush.msra.mxu2 %v320_v40  ;;  %v304_v18 = vld [vmem:[#allocation7 + $0x308] sm:$0xff]  ;;  %v386_v20 = vld [vmem:[#allocation7 + $0x598] sm:$0xff] }
  0x87   :  { %607 = vmatpush.msra.mxu0 %v250_v31  ;;  %627 = vmatpush.msra.mxu1 %v282_v38  ;;  %v420_v21 = vld [vmem:[#allocation7 + $0x6a8] sm:$0xff]  ;;  %v418_v23 = vld [vmem:[#allocation7 + $0x698] sm:$0xff]  ;;  %v737_v31 = vld [vmem:[#allocation8 + $0x70] sm:$0xff] }
  0x88   :  { %657 = vmatpush.msra.mxu3 %v366_v39  ;;  %645 = vmatpush.msra.mxu2 %v318_v45  ;;  %v384_v22 = vld [vmem:[#allocation7 + $0x588] sm:$0xff]  ;;  %v342_v24 = vld [vmem:[#allocation7 + $0x438] sm:$0xff] }
  0x89   :  { %608 = vmatpush.msra.mxu0 %v248_v37  ;;  %628 = vmatpush.msra.mxu1 %v280_v42  ;;  %v382_v25 = vld [vmem:[#allocation7 + $0x578] sm:$0xff]  ;;  %v416_v26 = vld [vmem:[#allocation7 + $0x688] sm:$0xff] }
  0x8a   :  { %658 = vmatpush.msra.mxu3 %v364_v43  ;;  %646 = vmatpush.msra.mxu2 %v316_v50  ;;  %v738_v27 = vld [vmem:[#allocation8 + $0x78] sm:$0xff]  ;;  %v340_v28 = vld [vmem:[#allocation7 + $0x428] sm:$0xff] }
  0x8b   :  { %609 = vmatpush.msra.mxu0 %v246_v41  ;;  %629 = vmatpush.msra.mxu1 %v278_v48  ;;  %v380_v29 = vld [vmem:[#allocation7 + $0x568] sm:$0xff]  ;;  %v414_v30 = vld [vmem:[#allocation7 + $0x678] sm:$0xff]  ;;  %v735_v41 = vld [vmem:[#allocation8 + $0x60] sm:$0xff] }
  0x8c   :  { %659 = vmatpush.msra.mxu3 %v362_v49  ;;  %647 = vmatpush.msra.mxu2 %v314_v54  ;;  %v338_v33 = vld [vmem:[#allocation7 + $0x418] sm:$0xff]  ;;  %v736_v35 = vld [vmem:[#allocation8 + $0x68] sm:$0xff]  ;;  %v733_v49 = vld [vmem:[#allocation8 + $0x50] sm:$0xff] }
  0x8d   :  { %610 = vmatpush.msra.mxu0 %v244_v47  ;;  %630 = vmatpush.msra.mxu1 %v276_v52  ;;  %v378_v34 = vld [vmem:[#allocation7 + $0x558] sm:$0xff]  ;;  %v336_v37 = vld [vmem:[#allocation7 + $0x408] sm:$0xff]  ;;  %v729_v54 = vld [vmem:[#allocation8 + $0x30] sm:$0xff] }
  0x8e   :  { %660 = vmatpush.msra.mxu3 %v360_v53  ;;  %648 = vmatpush.msra.mxu2 %v312_v60  ;;  %v376_v38 = vld [vmem:[#allocation7 + $0x548] sm:$0xff]  ;;  %v410_v39 = vld [vmem:[#allocation7 + $0x658] sm:$0xff] }
  0x8f   :  { %611 = vmatpush.msra.mxu0 %v242_v51  ;;  %631 = vmatpush.msra.mxu1 %v274_v56  ;;  %v408_v40 = vld [vmem:[#allocation7 + $0x648] sm:$0xff]  ;;  %v406_v43 = vld [vmem:[#allocation7 + $0x638] sm:$0xff]  ;;  %v727_v56 = vld [vmem:[#allocation8 + $0x20] sm:$0xff] }
  0x90   :  { %661 = vmatpush.msra.mxu3 %v358_v57  ;;  %649 = vmatpush.msra.mxu2 %v310_v2  ;;  %v372_v42 = vld [vmem:[#allocation7 + $0x528] sm:$0xff]  ;;  %v734_v45 = vld [vmem:[#allocation8 + $0x58] sm:$0xff] }
  0x91   :  { %612 = vmatpush.msra.mxu0 %v240_v55  ;;  %632 = vmatpush.msra.mxu1 %v272_v59  ;;  %v370_v47 = vld [vmem:[#allocation7 + $0x518] sm:$0xff]  ;;  %v404_v48 = vld [vmem:[#allocation7 + $0x628] sm:$0xff] }
  0x92   :  { %662 = vmatpush.msra.mxu3 %v356_v61  ;;  %650 = vmatpush.msra.mxu2 %v308_v10  ;;  %v368_v50 = vld [vmem:[#allocation7 + $0x508] sm:$0xff]  ;;  %v402_v51 = vld [vmem:[#allocation7 + $0x618] sm:$0xff] }
  0x93   :  { %677 = vmatpush.msrb.mxu0 %v398_v58  ;;  %697 = vmatpush.msrb.mxu1 %v430_v0  ;;  %v400_v52 = vld [vmem:[#allocation7 + $0x608] sm:$0xff]  ;;  %v730_v53 = vld [vmem:[#allocation8 + $0x38] sm:$0xff]  ;;  %v725_v58 = vld [vmem:[#allocation8 + $0x10] sm:$0xff] }
  0x94   :  { %663 = vmatpush.msra.mxu3 %v354_v3  ;;  %651 = vmatpush.msra.mxu2 %v306_v14  ;;  %v728_v55 = vld [vmem:[#allocation8 + $0x28] sm:$0xff]  ;;  %v726_v57 = vld [vmem:[#allocation8 + $0x18] sm:$0xff]  ;;  %v751_v0 = vld [vmem:[#allocation8 + $0xe0] sm:$0xff] }
  0x95   :  { %678 = vmatpush.msrb.mxu0 %v396_v62  ;;  %698 = vmatpush.msrb.mxu1 %v428_v6  ;;  %v724_v59 = vld [vmem:[#allocation8 + $0x8] sm:$0xff]  ;;  %v754_v60 = vld [vmem:[#allocation8 + $0xf8] sm:$0xff]  ;;  %v431_v62 = vld [vmem:[%s2333_s3] sm:$0x3] }
  0x96   :  { %593 = vmatmul.f32.vlgmr.msrb.gmra.mxu3 %v2254_v32  ;;  %v344_v32 = vld [vmem:[#allocation7 + $0x448] sm:$0xff]  ;;  %652 = vmatpush.msra.mxu2 %v304_v18  ;;  %v433_v2 = vperm.slane %v431_v62, 0  ;;  %v750_v3 = vld [vmem:[#allocation8 + $0xd8] sm:$0xff]  ;;  %v749_v6 = vld [vmem:[#allocation8 + $0xd0] sm:$0xff] }
  0x97   :  { %679 = vmatpush.msrb.mxu0 %v394_v4  ;;  %664 = vmatpush.msra.mxu3 %v352_v7  ;;  %v752_v61 = vld [vmem:[#allocation8 + $0xe8] sm:$0xff] }
  0x98   :  { %699 = vmatpush.msrb.mxu1 %v426_v9  ;;  %653 = vmatmul.f32.vlgmr.msra.gmra.mxu2 %v2256_v36  ;;  %v412_v36 = vld [vmem:[#allocation7 + $0x668] sm:$0xff] }
  0x99   :  { %680 = vmatpush.msrb.mxu0 %v392_v8  ;;  %665 = vmatpush.msra.mxu3 %v350_v11  ;;  %v748_v8 = vld [vmem:[#allocation8 + $0xc8] sm:$0xff] }
  0x9a   :  { %700 = vmatpush.msrb.mxu1 %v424_v13  ;;  %613 = vmatmul.f32.vlgmr.msra.gmra.mxu0 %v2260_v44  ;;  %v374_v44 = vld [vmem:[#allocation7 + $0x538] sm:$0xff] }
  0x9b   :  { %681 = vmatpush.msrb.mxu0 %v390_v12  ;;  %666 = vmatpush.msra.mxu3 %v348_v15 }
  0x9c   :  { %701 = vmatpush.msrb.mxu1 %v422_v17  ;;  %759 = vmatpush.msrb.mxu2 %v738_v27  ;;  %v742_v27 = vld [vmem:[#allocation8 + $0x98] sm:$0xff] }
  0x9d   :  { %682 = vmatpush.msrb.mxu0 %v388_v16  ;;  %667 = vmatpush.msra.mxu3 %v346_v19 }
  0x9e   :  { %702 = vmatpush.msrb.mxu1 %v420_v21  ;;  %760 = vmatpush.msrb.mxu2 %v737_v31  ;;  %v747_v21 = vld [vmem:[#allocation8 + $0xc0] sm:$0xff]  ;;  %v434_v31 = vperm.slane %v431_v62, 1  ;;  %v816_v62 = vld [vmem:[#allocation11 + $0x70] sm:$0xff] }
  0x9f   :  { %683 = vmatpush.msrb.mxu0 %v386_v20  ;;  %668 = vmatpush.msra.mxu3 %v344_v32 }
  0xa0   :  { %703 = vmatpush.msrb.mxu1 %v418_v23  ;;  %761 = vmatpush.msrb.mxu2 %v736_v35  ;;  %v746_v23 = vld [vmem:[#allocation8 + $0xb8] sm:$0xff] }
  0xa1   :  { %684 = vmatpush.msrb.mxu0 %v384_v22  ;;  %669 = vmatpush.msra.mxu3 %v342_v24  ;;  %v745_v24 = vld [vmem:[#allocation8 + $0xb0] sm:$0xff] }
  0xa2   :  { %704 = vmatpush.msrb.mxu1 %v416_v26  ;;  %762 = vmatpush.msrb.mxu2 %v735_v41  ;;  %v743_v26 = vld [vmem:[#allocation8 + $0xa0] sm:$0xff] }
  0xa3   :  { %685 = vmatpush.msrb.mxu0 %v382_v25  ;;  %670 = vmatpush.msra.mxu3 %v340_v28  ;;  %v744_v25 = vld [vmem:[#allocation8 + $0xa8] sm:$0xff]  ;;  %v741_v28 = vld [vmem:[#allocation8 + $0x90] sm:$0xff] }
  0xa4   :  { %705 = vmatpush.msrb.mxu1 %v414_v30  ;;  %763 = vmatpush.msrb.mxu2 %v734_v45  ;;  %v739_v30 = vld [vmem:[#allocation8 + $0x80] sm:$0xff] }
  0xa5   :  { %686 = vmatpush.msrb.mxu0 %v380_v29  ;;  %671 = vmatpush.msra.mxu3 %v338_v33  ;;  %v740_v29 = vld [vmem:[#allocation8 + $0x88] sm:$0xff] }
  0xa6   :  { %706 = vmatpush.msrb.mxu1 %v412_v36  ;;  %764 = vmatpush.msrb.mxu2 %v733_v49 }
  0xa7   :  { %687 = vmatpush.msrb.mxu0 %v378_v34  ;;  %672 = vmatpush.msra.mxu3 %v336_v37 }
  0xa8   :  { %707 = vmatpush.msrb.mxu1 %v410_v39  ;;  %673 = vmatmul.f32.vlgmr.msra.gmra.mxu3 %v2268_v1  ;;  %v732_v1 = vld [vmem:[#allocation8 + $0x48] sm:$0xff] }
  0xa9   :  { %688 = vmatpush.msrb.mxu0 %v376_v38  ;;  %633 = vmatmul.f32.vlgmr.msra.gmra.mxu1 %v2262_v46  ;;  %v731_v46 = vld [vmem:[#allocation8 + $0x40] sm:$0xff] }
  0xaa   :  { %708 = vmatpush.msrb.mxu1 %v408_v40  ;;  %765 = vmatpush.msrb.mxu2 %v732_v1  ;;  %v830_v1 = vld [vmem:[#allocation11 + $0xe0] sm:$0xff] }
  0xab   :  { %689 = vmatpush.msrb.mxu0 %v374_v44  ;;  %779 = vmatpush.msrb.mxu3 %v754_v60  ;;  %v821_v60 = vld [vmem:[#allocation11 + $0x98] sm:$0xff] }
  0xac   :  { %709 = vmatpush.msrb.mxu1 %v406_v43  ;;  %766 = vmatpush.msrb.mxu2 %v731_v46  ;;  %v828_v46 = vld [vmem:[#allocation11 + $0xd0] sm:$0xff] }
  0xad   :  { %690 = vmatpush.msrb.mxu0 %v372_v42 }
  0xae   :  { %710 = vmatpush.msrb.mxu1 %v404_v48  ;;  %767 = vmatpush.msrb.mxu2 %v730_v53  ;;  %v829_v53 = vld [vmem:[#allocation11 + $0xd8] sm:$0xff] }
  0xaf   :  { %691 = vmatpush.msrb.mxu0 %v370_v47 }
  0xb0   :  { %711 = vmatpush.msrb.mxu1 %v402_v51  ;;  %768 = vmatpush.msrb.mxu2 %v729_v54  ;;  %v833_v51 = vld [vmem:[#allocation11 + $0xf8] sm:$0xff]  ;;  %v826_v54 = vld [vmem:[#allocation11 + $0xc0] sm:$0xff] }
  0xb1   :  { %692 = vmatpush.msrb.mxu0 %v368_v50  ;;  %v832_v50 = vld [vmem:[#allocation11 + $0xf0] sm:$0xff] }
  0xb2   :  { %693 = vmatmul.f32.vlgmr.msrb.gmra.mxu0 %v2271_v5  ;;  %712 = vmatpush.msrb.mxu1 %v400_v52  ;;  %v723_v5 = vld [vmem:[#allocation8] sm:$0xff]  ;;  %v831_v52 = vld [vmem:[#allocation11 + $0xe8] sm:$0xff] }
  0xb3   :  { %713 = vmatmul.f32.vlgmr.msrb.gmra.mxu1 %v2266_v63  ;;  %769 = vmatpush.msrb.mxu2 %v728_v55  ;;  %v753_v63 = vld [vmem:[#allocation8 + $0xf0] sm:$0xff] }
  0xb4   :  { %780 = vmatpush.msrb.mxu3 %v753_v63  ;;  %840 = vmatpush.msra.mxu0 %v832_v50  ;;  %v827_v55 = vld [vmem:[#allocation11 + $0xc8] sm:$0xff]  ;;  %v818_v63 = vld [vmem:[#allocation11 + $0x80] sm:$0xff]  ;;  %v954_v50 = vld [vmem:[#allocation14 + $0xb8] sm:$0xff] }
  0xb5   :  { %770 = vmatpush.msrb.mxu2 %v727_v56  ;;  %860 = vmatpush.msra.mxu1 %v833_v51  ;;  %v824_v56 = vld [vmem:[#allocation11 + $0xb0] sm:$0xff]  ;;  %v834_v51 = vld [vmem:[%s2337_s7] sm:$0x3] }
  0xb6   :  { %781 = vmatpush.msrb.mxu3 %v752_v61  ;;  %841 = vmatpush.msra.mxu0 %v830_v1  ;;  %v819_v61 = vld [vmem:[#allocation11 + $0x88] sm:$0xff]  ;;  %v951_v1 = vld [vmem:[#allocation14 + $0xa0] sm:$0xff] }
  0xb7   :  { %771 = vmatpush.msrb.mxu2 %v726_v57  ;;  %861 = vmatpush.msra.mxu1 %v831_v52  ;;  %v825_v57 = vld [vmem:[#allocation11 + $0xb8] sm:$0xff]  ;;  %v952_v52 = vld [vmem:[#allocation14 + $0xa8] sm:$0xff] }
  0xb8   :  { %782 = vmatpush.msrb.mxu3 %v751_v0  ;;  %842 = vmatpush.msra.mxu0 %v828_v46  ;;  %v817_v0 = vld [vmem:[#allocation11 + $0x78] sm:$0xff]  ;;  %v949_v46 = vld [vmem:[#allocation14 + $0x90] sm:$0xff] }
  0xb9   :  { %772 = vmatpush.msrb.mxu2 %v725_v58  ;;  %862 = vmatpush.msra.mxu1 %v829_v53  ;;  %v822_v58 = vld [vmem:[#allocation11 + $0xa0] sm:$0xff]  ;;  %v950_v53 = vld [vmem:[#allocation14 + $0x98] sm:$0xff] }
  0xba   :  { %783 = vmatpush.msrb.mxu3 %v750_v3  ;;  %843 = vmatpush.msra.mxu0 %v826_v54  ;;  %v815_v3 = vld [vmem:[#allocation11 + $0x68] sm:$0xff]  ;;  %v836_v54 = vperm.slane %v834_v51, 0 }
  0xbb   :  { %773 = vmatpush.msrb.mxu2 %v724_v59  ;;  %863 = vmatpush.msra.mxu1 %v827_v55  ;;  %v823_v59 = vld [vmem:[#allocation11 + $0xa8] sm:$0xff]  ;;  %v837_v55 = vperm.slane %v834_v51, 1 }
  0xbc   :  { %784 = vmatpush.msrb.mxu3 %v749_v6  ;;  %844 = vmatpush.msra.mxu0 %v824_v56  ;;  %v813_v6 = vld [vmem:[#allocation11 + $0x58] sm:$0xff]  ;;  %v947_v56 = vld [vmem:[#allocation14 + $0x80] sm:$0xff] }
  0xbd   :  { %774 = vmatpush.msrb.mxu2 %v723_v5  ;;  %864 = vmatpush.msra.mxu1 %v825_v57  ;;  %v820_v5 = vld [vmem:[#allocation11 + $0x90] sm:$0xff]  ;;  %v948_v57 = vld [vmem:[#allocation14 + $0x88] sm:$0xff] }
  0xbe   :  { %785 = vmatpush.msrb.mxu3 %v748_v8  ;;  %845 = vmatpush.msra.mxu0 %v822_v58  ;;  %v811_v8 = vld [vmem:[#allocation11 + $0x48] sm:$0xff] }
  0xbf   :  { %865 = vmatpush.msra.mxu1 %v823_v59  ;;  %v1079_v51 = vld [vmem:[#allocation17 + $0x200] sm:$0xff] }
  0xc0   :  { %786 = vmatpush.msrb.mxu3 %v747_v21  ;;  %846 = vmatpush.msra.mxu0 %v820_v5  ;;  %v899_v21 = vld [vmem:[#allocation13 + $0x58] sm:$0xff]  ;;  %v945_v5 = vld [vmem:[#allocation14 + $0x70] sm:$0xff] }
  0xc1   :  { %866 = vmatpush.msra.mxu1 %v821_v60  ;;  %v946_v60 = vld [vmem:[#allocation14 + $0x78] sm:$0xff] }
  0xc2   :  { %787 = vmatpush.msrb.mxu3 %v746_v23  ;;  %847 = vmatpush.msra.mxu0 %v818_v63  ;;  %v1754_v23 = vld [vmem:[#allocation10] ss:$0 sm:$0xff] }
  0xc3   :  { %867 = vmatpush.msra.mxu1 %v819_v61 }
  0xc4   :  { %788 = vmatpush.msrb.mxu3 %v745_v24  ;;  %848 = vmatpush.msra.mxu0 %v816_v62  ;;  %v943_v62 = vld [vmem:[#allocation14 + $0x60] sm:$0xff] }
  0xc5   :  { %868 = vmatpush.msra.mxu1 %v817_v0  ;;  %v944_v0 = vld [vmem:[#allocation14 + $0x68] sm:$0xff] }
  0xc6   :  { %789 = vmatpush.msrb.mxu3 %v744_v25 }
  0xc7   :  { %869 = vmatpush.msra.mxu1 %v815_v3  ;;  %v941_v3 = vld [vmem:[#allocation14 + $0x50] sm:$0xff] }
  0xc8   :  { %790 = vmatpush.msrb.mxu3 %v743_v26 }
  0xc9   :  { %870 = vmatpush.msra.mxu1 %v813_v6 }
  0xca   :  { %791 = vmatpush.msrb.mxu3 %v742_v27 }
  0xcb   :  { %871 = vmatpush.msra.mxu1 %v811_v8  ;;  %v940_v8 = vld [vmem:[#allocation14 + $0x48] sm:$0xff] }
  0xcc   :  { %792 = vmatpush.msrb.mxu3 %v741_v28 }
  0xce   :  { %793 = vmatpush.msrb.mxu3 %v740_v29 }
  0xd0   :  { %794 = vmatpush.msrb.mxu3 %v739_v30  ;;  %v896_v30 = vld [vmem:[#allocation13 + $0x40] sm:$0xff] }
  0xe1   :  { %v454_v4 = vpop.f32.mrf.mxu0 }
  0xe2   :  { %v455_v7 = vadd.f32 %v454_v4, %v433_v2  ;;  %v814_v2 = vld [vmem:[#allocation11 + $0x60] sm:$0xff]  ;;  %v812_v4 = vld [vmem:[#allocation11 + $0x50] sm:$0xff] }
  0xe3   :  { %849 = vmatpush.msra.mxu0 %v814_v2 }
  0xe5   :  { %850 = vmatpush.msra.mxu0 %v812_v4  ;;  %v942_v4 = vld [vmem:[#allocation14 + $0x58] sm:$0xff] }
  0xe7   :  { %v474_v9 = vpop.f32.mrf.mxu1 }
  0xe8   :  { %v475_v10 = vadd.f32 %v474_v9, %v455_v7  ;;  %v810_v7 = vld [vmem:[#allocation11 + $0x40] sm:$0xff]  ;;  %v808_v9 = vld [vmem:[#allocation11 + $0x30] sm:$0xff] }
  0xe9   :  { %v514_v12 = vpop.f32.mrf.mxu3  ;;  %851 = vmatpush.msra.mxu0 %v810_v7  ;;  %v939_v7 = vld [vmem:[#allocation14 + $0x40] sm:$0xff] }
  0xeb   :  { %852 = vmatpush.msra.mxu0 %v808_v9  ;;  %v937_v9 = vld [vmem:[#allocation14 + $0x30] sm:$0xff] }
  0xef   :  { %v494_v11 = vpop.f32.mrf.mxu2  ;;  %v534_v15 = vpop.f32.mrf.mxu0 }
  0xf0   :  { %v495_v13 = vadd.f32 %v494_v11, %v475_v10  ;;  %v809_v10 = vld [vmem:[#allocation11 + $0x38] sm:$0xff]  ;;  %v806_v11 = vld [vmem:[#allocation11 + $0x20] sm:$0xff] }
  0xf1   :  { %872 = vmatpush.msra.mxu1 %v809_v10  ;;  %853 = vmatpush.msra.mxu0 %v806_v11  ;;  %v938_v10 = vld [vmem:[#allocation14 + $0x38] sm:$0xff] }
  0xf2   :  { %v515_v14 = vadd.f32 %v514_v12, %v495_v13  ;;  %v807_v12 = vld [vmem:[#allocation11 + $0x28] sm:$0xff]  ;;  %v804_v13 = vld [vmem:[#allocation11 + $0x10] sm:$0xff] }
  0xf3   :  { %v554_v17 = vpop.f32.mrf.mxu1  ;;  %873 = vmatpush.msra.mxu1 %v807_v12  ;;  %854 = vmatpush.msra.mxu0 %v804_v13  ;;  %v885_v11 = vld [vmem:[#allocation5] sm:$0xff] }
  0xf4   :  { %v535_v16 = vadd.f32 %v534_v15, %v515_v14  ;;  %v805_v14 = vld [vmem:[#allocation11 + $0x18] sm:$0xff]  ;;  %v802_v15 = vld [vmem:[#allocation11] sm:$0xff] }
  0xf5   :  { %874 = vmatpush.msra.mxu1 %v805_v14  ;;  %855 = vmatpush.msra.mxu0 %v802_v15  ;;  %v935_v15 = vld [vmem:[#allocation14 + $0x20] sm:$0xff] }
  0xf6   :  { %v555_v18 = vadd.f32 %v554_v17, %v535_v16  ;;  %v803_v16 = vld [vmem:[#allocation11 + $0x8] sm:$0xff]  ;;  %v903_v17 = vld [vmem:[#allocation13 + $0x78] sm:$0xff] }
  0xf7   :  { %875 = vmatpush.msra.mxu1 %v803_v16  ;;  %908 = vmatpush.msra.mxu2 %v903_v17  ;;  %v936_v16 = vld [vmem:[#allocation14 + $0x28] sm:$0xff]  ;;  %v933_v17 = vld [vmem:[#allocation14 + $0x10] sm:$0xff] }
  0xf9   :  { %v574_v19 = vpop.f32.mrf.mxu2 }
  0xfa   :  { %v575_v20 = vadd.f32 %v574_v19, %v555_v18  ;;  %v902_v18 = vld [vmem:[#allocation13 + $0x70] sm:$0xff]  ;;  %v901_v19 = vld [vmem:[#allocation13 + $0x68] sm:$0xff] }
  0xfb   :  { %909 = vmatpush.msra.mxu2 %v902_v18  ;;  %v934_v18 = vld [vmem:[#allocation14 + $0x18] sm:$0xff] }
  0xfc   :  { %vm717_vm0 = vcmp.ge.f32.partialorder %v575_v20, 0.0  ;;  %v719_v32 = vmul.f32 0.1, %v575_v20 }
  0xfd   :  { %910 = vmatpush.msra.mxu2 %v901_v19  ;;  %v931_v19 = vld [vmem:[#allocation14] sm:$0xff] }
  0xfe   :  { %v721_v22 = vsel %vm717_vm0, %v575_v20, %v719_v32  ;;  %v900_v20 = vld [vmem:[#allocation13 + $0x60] sm:$0xff]  ;;  %v898_v32 = vld [vmem:[#allocation13 + $0x50] sm:$0xff] }
  0xff   :  { %775 = vmatmul.f32.vlgmr.msrb.gmra.mxu2 %v721_v22  ;;  %v897_v22 = vld [vmem:[#allocation13 + $0x48] sm:$0xff] }
 0x100   :  { %911 = vmatpush.msra.mxu2 %v900_v20  ;;  %v932_v20 = vld [vmem:[#allocation14 + $0x8] sm:$0xff] }
 0x102   :  { %912 = vmatpush.msra.mxu2 %v899_v21  ;;  %v1232_v21 = vld [vmem:[#allocation17 + $0x6c8] sm:$0xff] }
 0x104   :  { %913 = vmatpush.msra.mxu2 %v898_v32  ;;  %v1233_v32 = vld [vmem:[#allocation17 + $0x6d0] sm:$0xff] }
 0x106   :  { %914 = vmatpush.msra.mxu2 %v897_v22  ;;  %v1225_v22 = vld [vmem:[#allocation17 + $0x690] sm:$0xff] }
 0x108   :  { %915 = vmatpush.msra.mxu2 %v896_v30  ;;  %v1212_v30 = vld [vmem:[#allocation17 + $0x628] sm:$0xff] }
 0x117   :  { %v614_v36 = vpop.f32.mrf.mxu0 }
 0x119   :  { %v594_v33 = vpop.f32.mrf.mxu3 }
 0x11a   :  { %v595_v34 = vadd.f32 %v594_v33, %v434_v31  ;;  %v895_v31 = vld [vmem:[#allocation13 + $0x38] sm:$0xff]  ;;  %v894_v33 = vld [vmem:[#allocation13 + $0x30] sm:$0xff] }
 0x11b   :  { %v654_v38 = vpop.f32.mrf.mxu2  ;;  %916 = vmatpush.msra.mxu2 %v895_v31  ;;  %v1114_v31 = vld [vmem:[#allocation17 + $0x318] sm:$0xff] }
 0x11c   :  { %v615_v35 = vadd.f32 %v614_v36, %v595_v34  ;;  %v893_v34 = vld [vmem:[#allocation13 + $0x28] sm:$0xff]  ;;  %v892_v36 = vld [vmem:[#allocation13 + $0x20] sm:$0xff] }
 0x11d   :  { %917 = vmatpush.msra.mxu2 %v894_v33  ;;  %v1106_v33 = vld [vmem:[#allocation17 + $0x2d8] sm:$0xff] }
 0x11f   :  { %918 = vmatpush.msra.mxu2 %v893_v34  ;;  %v1107_v34 = vld [vmem:[#allocation17 + $0x2e0] sm:$0xff] }
 0x121   :  { %919 = vmatpush.msra.mxu2 %v892_v36  ;;  %v1204_v36 = vld [vmem:[#allocation17 + $0x5e8] sm:$0xff] }
 0x126   :  { %v634_v37 = vpop.f32.mrf.mxu1 }
 0x127   :  { %v635_v39 = vadd.f32 %v634_v37, %v615_v35  ;;  %v891_v35 = vld [vmem:[#allocation13 + $0x18] sm:$0xff]  ;;  %v890_v37 = vld [vmem:[#allocation13 + $0x10] sm:$0xff] }
 0x128   :  { %920 = vmatpush.msra.mxu2 %v891_v35  ;;  %v1205_v35 = vld [vmem:[#allocation17 + $0x5f0] sm:$0xff] }
 0x129   :  { %v655_v44 = vadd.f32 %v654_v38, %v635_v39  ;;  %v889_v38 = vld [vmem:[#allocation13 + $0x8] sm:$0xff]  ;;  %v888_v39 = vld [vmem:[#allocation13] sm:$0xff] }
 0x12a   :  { %921 = vmatpush.msra.mxu2 %v890_v37  ;;  %v1099_v37 = vld [vmem:[#allocation17 + $0x2a0] sm:$0xff] }
 0x12b   :  { %v674_v40 = vpop.f32.mrf.mxu3 }
 0x12c   :  { %v675_v41 = vadd.f32 %v674_v40, %v655_v44  ;;  %922 = vmatpush.msra.mxu2 %v889_v38  ;;  %v961_v44 = vld [vmem:[#allocation14 + $0xf0] sm:$0xff]  ;;  %v962_v40 = vld [vmem:[#allocation14 + $0xf8] sm:$0xff] }
 0x12d   :  { %969 = vmatpush.msra.mxu3 %v961_v44  ;;  %989 = vmatpush.msrb.mxu0 %v962_v40  ;;  %v1100_v38 = vld [vmem:[#allocation17 + $0x2a8] sm:$0xff]  ;;  %v1198_v44 = vld [vmem:[#allocation17 + $0x5b8] sm:$0xff] }
 0x12e   :  { %923 = vmatpush.msra.mxu2 %v888_v39  ;;  %v1197_v39 = vld [vmem:[#allocation17 + $0x5b0] sm:$0xff]  ;;  %v1092_v40 = vld [vmem:[#allocation17 + $0x268] sm:$0xff] }
 0x12f   :  { %v694_v42 = vpop.f32.mrf.mxu0 }
 0x130   :  { %v695_v43 = vadd.f32 %v694_v42, %v675_v41  ;;  %v714_v45 = vpop.f32.mrf.mxu1  ;;  %v959_v41 = vld [vmem:[#allocation14 + $0xe0] sm:$0xff]  ;;  %v960_v42 = vld [vmem:[#allocation14 + $0xe8] sm:$0xff]  ;;  %1275 = vmatpush.msrb.mxu2 %v1232_v21 }
 0x131   :  { %970 = vmatpush.msra.mxu3 %v959_v41  ;;  %990 = vmatpush.msrb.mxu0 %v960_v42  ;;  %v1093_v41 = vld [vmem:[#allocation17 + $0x270] sm:$0xff]  ;;  %v1190_v42 = vld [vmem:[#allocation17 + $0x578] sm:$0xff] }
 0x132   :  { %v715_v47 = vadd.f32 %v714_v45, %v695_v43  ;;  %v957_v43 = vld [vmem:[#allocation14 + $0xd0] sm:$0xff]  ;;  %v958_v45 = vld [vmem:[#allocation14 + $0xd8] sm:$0xff]  ;;  %1276 = vmatpush.msrb.mxu2 %v1225_v22 }
 0x133   :  { %971 = vmatpush.msra.mxu3 %v957_v43  ;;  %991 = vmatpush.msrb.mxu0 %v958_v45  ;;  %v1191_v43 = vld [vmem:[#allocation17 + $0x580] sm:$0xff]  ;;  %v1085_v45 = vld [vmem:[#allocation17 + $0x230] sm:$0xff]  ;;  %v1234_v21 = vld [vmem:[#allocation17 + $0x6d8] sm:$0xff] }
 0x134   :  { %vm718_vm1 = vcmp.ge.f32.partialorder %v715_v47, 0.0  ;;  %v720_v48 = vmul.f32 0.1, %v715_v47 }
 0x136   :  { %v722_v49 = vsel %vm718_vm1, %v715_v47, %v720_v48  ;;  %v955_v47 = vld [vmem:[#allocation14 + $0xc0] sm:$0xff]  ;;  %v956_v48 = vld [vmem:[#allocation14 + $0xc8] sm:$0xff] }
 0x137   :  { %795 = vmatmul.f32.vlgmr.msrb.gmra.mxu3 %v722_v49  ;;  %v953_v49 = vld [vmem:[#allocation14 + $0xb0] sm:$0xff]  ;;  %992 = vmatpush.msrb.mxu0 %v956_v48  ;;  %v1183_v48 = vld [vmem:[#allocation17 + $0x540] sm:$0xff] }
 0x138   :  { %972 = vmatpush.msra.mxu3 %v955_v47  ;;  %v1086_v47 = vld [vmem:[#allocation17 + $0x238] sm:$0xff] }
 0x139   :  { %993 = vmatpush.msrb.mxu0 %v954_v50  ;;  %v1078_v50 = vld [vmem:[#allocation17 + $0x1f8] sm:$0xff] }
 0x13a   :  { %973 = vmatpush.msra.mxu3 %v953_v49  ;;  %v1184_v49 = vld [vmem:[#allocation17 + $0x548] sm:$0xff] }
 0x13b   :  { %994 = vmatpush.msrb.mxu0 %v952_v52  ;;  %v1177_v52 = vld [vmem:[#allocation17 + $0x510] sm:$0xff] }
 0x13c   :  { %974 = vmatpush.msra.mxu3 %v951_v1  ;;  %v1176_v1 = vld [vmem:[#allocation17 + $0x508] sm:$0xff] }
 0x13d   :  { %995 = vmatpush.msrb.mxu0 %v950_v53  ;;  %v1072_v53 = vld [vmem:[#allocation17 + $0x1c8] sm:$0xff] }
 0x13e   :  { %975 = vmatpush.msra.mxu3 %v949_v46  ;;  %v1071_v46 = vld [vmem:[#allocation17 + $0x1c0] sm:$0xff] }
 0x13f   :  { %996 = vmatpush.msrb.mxu0 %v948_v57  ;;  %v1065_v57 = vld [vmem:[#allocation17 + $0x190] sm:$0xff] }
 0x140   :  { %976 = vmatpush.msra.mxu3 %v947_v56  ;;  %v1064_v56 = vld [vmem:[#allocation17 + $0x188] sm:$0xff] }
 0x141   :  { %997 = vmatpush.msrb.mxu0 %v946_v60  ;;  %v1058_v60 = vld [vmem:[#allocation17 + $0x158] sm:$0xff] }
 0x142   :  { %977 = vmatpush.msra.mxu3 %v945_v5  ;;  %v1057_v5 = vld [vmem:[#allocation17 + $0x150] sm:$0xff] }
 0x143   :  { %998 = vmatpush.msrb.mxu0 %v944_v0  ;;  %v1051_v0 = vld [vmem:[#allocation17 + $0x120] sm:$0xff] }
 0x144   :  { %978 = vmatpush.msra.mxu3 %v943_v62  ;;  %v1050_v62 = vld [vmem:[#allocation17 + $0x118] sm:$0xff] }
 0x145   :  { %999 = vmatpush.msrb.mxu0 %v942_v4  ;;  %v1755_v4 = vld [vmem:[%s2339_s9] ss:$0 sm:$0xff]  ;;  %s2130_s9 = smov [#allocation20]  }
 0x146   :  { %979 = vmatpush.msra.mxu3 %v941_v3  ;;  %v1149_v3 = vld [vmem:[#allocation17 + $0x430] sm:$0xff]  ;;  %s1691_s29 = sshll.u32 %s2130_s9, 4  ;;  %s1692_s29 = int_to_ptr.vmem [resolvable:$true] %s1691_s29 }
 0x147   :  { %1000 = vmatpush.msrb.mxu0 %v940_v8  ;;  %v1141_v8 = vld [vmem:[#allocation17 + $0x3f0] sm:$0xff] }
 0x148   :  { %980 = vmatpush.msra.mxu3 %v939_v7  ;;  %v1044_v7 = vld [vmem:[#allocation17 + $0xe8] sm:$0xff] }
 0x149   :  { %1001 = vmatpush.msrb.mxu0 %v938_v10  ;;  %v1036_v10 = vld [vmem:[#allocation17 + $0xa8] sm:$0xff] }
 0x14a   :  { %981 = vmatpush.msra.mxu3 %v937_v9  ;;  %v1142_v9 = vld [vmem:[#allocation17 + $0x3f8] sm:$0xff] }
 0x14b   :  { %1002 = vmatpush.msrb.mxu0 %v936_v16  ;;  %v1029_v16 = vld [vmem:[#allocation17 + $0x70] sm:$0xff] }
 0x14c   :  { %982 = vmatpush.msra.mxu3 %v935_v15 }
 0x14d   :  { %1003 = vmatpush.msrb.mxu0 %v934_v18  ;;  %v1127_v18 = vld [vmem:[#allocation17 + $0x380] sm:$0xff] }
 0x14e   :  { %983 = vmatpush.msra.mxu3 %v933_v17  ;;  %v1030_v17 = vld [vmem:[#allocation17 + $0x78] sm:$0xff] }
 0x14f   :  { %1004 = vmatpush.msrb.mxu0 %v932_v20 }
 0x150   :  { %984 = vmatpush.msra.mxu3 %v931_v19  ;;  %v1128_v19 = vld [vmem:[#allocation17 + $0x388] sm:$0xff] }
 0x182   :  { %v776_v24 = vpop.f32.mrf.mxu2 }
 0x183   :  { %v777_v25 = vadd.f32 %v1754_v23, %v776_v24  ;;  %v1226_v23 = vld [vmem:[#allocation17 + $0x698] sm:$0xff] }
 0x184   :  { %v1218_v24 = vld [vmem:[#allocation17 + $0x658] sm:$0xff] }
 0x185   :  { %1277 = vmatpush.msrb.mxu2 %v1218_v24  ;;  %v1023_v24 = vld [vmem:[#allocation17 + $0x40] sm:$0xff] }
 0x1ba   :  { %v796_v26 = vpop.f32.mrf.mxu3 }
 0x1bb   :  { %v797_v27 = vadd.f32 %v796_v26, %v777_v25  ;;  %v1219_v25 = vld [vmem:[#allocation17 + $0x660] sm:$0xff]  ;;  %v1120_v26 = vld [vmem:[#allocation17 + $0x348] sm:$0xff] }
 0x1bc   :  { %1255 = vmatpush.msrb.mxu1 %v1120_v26  ;;  %v1228_v26 = vld [vmem:[#allocation17 + $0x6a8] sm:$0xff] }
 0x1bd   :  { %vm799_vm2 = vcmp.ge.f32.partialorder %v797_v27, 0.0  ;;  %v800_v28 = vmul.f32 0.1, %v797_v27 }
 0x1bf   :  { %v801_v29 = vsel %vm799_vm2, %v797_v27, %v800_v28  ;;  %v1121_v27 = vld [vmem:[#allocation17 + $0x350] sm:$0xff] }
 0x1c0   :  { %856 = vmatmul.f32.vlgmr.msra.gmra.mxu0 %v801_v29  ;;  %876 = vmatmul.f32.vlgmr.msra.gmra.mxu1 %v801_v29  ;;  %v1113_v28 = vld [vmem:[#allocation17 + $0x310] sm:$0xff]  ;;  %v1211_v29 = vld [vmem:[#allocation17 + $0x620] sm:$0xff] }
 0x1c1   :  { %1315 = vmatpush.msra.mxu0 %v1233_v32  ;;  %1295 = vmatpush.msrb.mxu3 %v1121_v27  ;;  %v1235_v32 = vld [vmem:[#allocation17 + $0x6e0] sm:$0xff] }
 0x1c2   :  { %1256 = vmatpush.msrb.mxu1 %v1113_v28  ;;  %1278 = vmatpush.msrb.mxu2 %v1211_v29  ;;  %v1015_v27 = vld [vmem:[#allocation17] sm:$0xff]  ;;  %v1016_v28 = vld [vmem:[#allocation17 + $0x8] sm:$0xff] }
 0x1c3   :  { %1316 = vmatpush.msra.mxu0 %v1226_v23  ;;  %1296 = vmatpush.msrb.mxu3 %v1114_v31  ;;  %v1022_v23 = vld [vmem:[#allocation17 + $0x38] sm:$0xff]  ;;  %v1220_v29 = vld [vmem:[#allocation17 + $0x668] sm:$0xff] }
 0x1c4   :  { %1257 = vmatpush.msrb.mxu1 %v1106_v33  ;;  %1279 = vmatpush.msrb.mxu2 %v1204_v36  ;;  %v1122_v31 = vld [vmem:[#allocation17 + $0x358] sm:$0xff]  ;;  %v1123_v33 = vld [vmem:[#allocation17 + $0x360] sm:$0xff] }
 0x1c5   :  { %1317 = vmatpush.msra.mxu0 %v1219_v25  ;;  %1297 = vmatpush.msrb.mxu3 %v1107_v34  ;;  %v1227_v25 = vld [vmem:[#allocation17 + $0x6a0] sm:$0xff]  ;;  %v1213_v34 = vld [vmem:[#allocation17 + $0x630] sm:$0xff]  ;;  %v1214_v36 = vld [vmem:[#allocation17 + $0x638] sm:$0xff] }
 0x1c6   :  { %1258 = vmatpush.msrb.mxu1 %v1099_v37  ;;  %1280 = vmatpush.msrb.mxu2 %v1197_v39  ;;  %v1116_v37 = vld [vmem:[#allocation17 + $0x328] sm:$0xff]  ;;  %v1207_v39 = vld [vmem:[#allocation17 + $0x600] sm:$0xff] }
 0x1c7   :  { %1318 = vmatpush.msra.mxu0 %v1212_v30  ;;  %1298 = vmatpush.msrb.mxu3 %v1100_v38  ;;  %v1221_v30 = vld [vmem:[#allocation17 + $0x670] sm:$0xff]  ;;  %v1206_v38 = vld [vmem:[#allocation17 + $0x5f8] sm:$0xff] }
 0x1c8   :  { %1259 = vmatpush.msrb.mxu1 %v1092_v40  ;;  %1281 = vmatpush.msrb.mxu2 %v1190_v42  ;;  %v1109_v40 = vld [vmem:[#allocation17 + $0x2f0] sm:$0xff]  ;;  %v1200_v42 = vld [vmem:[#allocation17 + $0x5c8] sm:$0xff] }
 0x1c9   :  { %1319 = vmatpush.msra.mxu0 %v1205_v35  ;;  %1299 = vmatpush.msrb.mxu3 %v1093_v41  ;;  %v1115_v35 = vld [vmem:[#allocation17 + $0x320] sm:$0xff] }
 0x1ca   :  { %1260 = vmatpush.msrb.mxu1 %v1085_v45  ;;  %1282 = vmatpush.msrb.mxu2 %v1183_v48  ;;  %v1199_v41 = vld [vmem:[#allocation17 + $0x5c0] sm:$0xff]  ;;  %v1102_v45 = vld [vmem:[#allocation17 + $0x2b8] sm:$0xff]  ;;  %v1193_v48 = vld [vmem:[#allocation17 + $0x590] sm:$0xff] }
 0x1cb   :  { %1320 = vmatpush.msra.mxu0 %v1198_v44  ;;  %1300 = vmatpush.msrb.mxu3 %v1086_v47  ;;  %v1108_v44 = vld [vmem:[#allocation17 + $0x2e8] sm:$0xff] }
 0x1cc   :  { %1261 = vmatpush.msrb.mxu1 %v1078_v50  ;;  %1283 = vmatpush.msrb.mxu2 %v1176_v1  ;;  %v1192_v47 = vld [vmem:[#allocation17 + $0x588] sm:$0xff]  ;;  %v1095_v50 = vld [vmem:[#allocation17 + $0x280] sm:$0xff]  ;;  %v1186_v1 = vld [vmem:[#allocation17 + $0x558] sm:$0xff] }
 0x1cd   :  { %1321 = vmatpush.msra.mxu0 %v1191_v43  ;;  %1301 = vmatpush.msrb.mxu3 %v1079_v51  ;;  %v1101_v43 = vld [vmem:[#allocation17 + $0x2b0] sm:$0xff] }
 0x1ce   :  { %1262 = vmatpush.msrb.mxu1 %v1071_v46  ;;  %v1185_v51 = vld [vmem:[#allocation17 + $0x550] sm:$0xff]  ;;  %v1088_v46 = vld [vmem:[#allocation17 + $0x248] sm:$0xff] }
 0x1cf   :  { %1322 = vmatpush.msra.mxu0 %v1184_v49  ;;  %1302 = vmatpush.msrb.mxu3 %v1072_v53  ;;  %v1094_v49 = vld [vmem:[#allocation17 + $0x278] sm:$0xff] }
 0x1d0   :  { %1263 = vmatpush.msrb.mxu1 %v1064_v56  ;;  %v1178_v53 = vld [vmem:[#allocation17 + $0x518] sm:$0xff]  ;;  %v1081_v56 = vld [vmem:[#allocation17 + $0x210] sm:$0xff] }
 0x1d1   :  { %1323 = vmatpush.msra.mxu0 %v1177_v52  ;;  %1303 = vmatpush.msrb.mxu3 %v1065_v57  ;;  %v1087_v52 = vld [vmem:[#allocation17 + $0x240] sm:$0xff] }
 0x1d2   :  { %1264 = vmatpush.msrb.mxu1 %v1057_v5  ;;  %v1171_v57 = vld [vmem:[#allocation17 + $0x4e0] sm:$0xff]  ;;  %v1074_v5 = vld [vmem:[#allocation17 + $0x1d8] sm:$0xff] }
 0x1d3   :  { %1304 = vmatpush.msrb.mxu3 %v1058_v60  ;;  %v1164_v60 = vld [vmem:[#allocation17 + $0x4a8] sm:$0xff] }
 0x1d4   :  { %1265 = vmatpush.msrb.mxu1 %v1050_v62  ;;  %v1067_v62 = vld [vmem:[#allocation17 + $0x1a0] sm:$0xff] }
 0x1d5   :  { %1305 = vmatpush.msrb.mxu3 %v1051_v0  ;;  %v1157_v0 = vld [vmem:[#allocation17 + $0x470] sm:$0xff] }
 0x1d7   :  { %1306 = vmatpush.msrb.mxu3 %v1044_v7  ;;  %v1151_v7 = vld [vmem:[#allocation17 + $0x440] sm:$0xff] }
 0x23d   :  { %v857_v58 = vpop.f32.mrf.mxu0  ;;  %v877_v59 = vpop.f32.mrf.mxu1 }
 0x23e   :  { %v858_v63 = vadd.f32 %v857_v58, %v836_v54  ;;  %v878_v61 = vadd.f32 %v877_v59, %v837_v55  ;;  %v1169_v54 = vld [vmem:[#allocation17 + $0x4d0] sm:$0xff]  ;;  %v1170_v55 = vld [vmem:[#allocation17 + $0x4d8] sm:$0xff]  ;;  %v1163_v59 = vld [vmem:[#allocation17 + $0x4a0] sm:$0xff] }
 0x23f   :  { %v1162_v58 = vld [vmem:[#allocation17 + $0x498] sm:$0xff]  ;;  %1284 = vmatpush.msrb.mxu2 %v1169_v54  ;;  %1324 = vmatpush.msra.mxu0 %v1170_v55  ;;  %v1179_v54 = vld [vmem:[#allocation17 + $0x520] sm:$0xff]  ;;  %v1080_v55 = vld [vmem:[#allocation17 + $0x208] sm:$0xff] }
 0x240   :  { %880 = vst [vmem:[#allocation20] sm:$0xff] %v858_v63  ;;  %v882_v2 = vmul.f32 0.5, %v878_v61 }
 0x241   :  { %881 = vst [vmem:[#allocation22] sm:$0xff] %v878_v61  ;;  %v1156_v61 = vld [vmem:[#allocation17 + $0x468] sm:$0xff]  ;;  %1285 = vmatpush.msrb.mxu2 %v1162_v58  ;;  %1325 = vmatpush.msra.mxu0 %v1163_v59  ;;  %v1073_v59 = vld [vmem:[#allocation17 + $0x1d0] sm:$0xff]  ;;  %1696 = dma.vmem_to_hbm [thread:$0]  %s1692_s29, 128, %s1694_s28, [#allocation21]  }
 0x242   :  { %v883_v6 = vmul.f32 1.442695, %v882_v2  ;;  %v1148_v2 = vld [vmem:[#allocation17 + $0x428] sm:$0xff]  ;;  %1707 = dma.vmem_to_hbm [thread:$0]  %s1703_s30, 128, %s1705_s1, [#allocation21]  }
 0x243   :  { %1326 = vmatpush.msra.mxu0 %v1156_v61  ;;  %v1172_v58 = vld [vmem:[#allocation17 + $0x4e8] sm:$0xff]  ;;  %v1066_v61 = vld [vmem:[#allocation17 + $0x198] sm:$0xff] }
 0x244   :  { %1756 = vpow2.f32 %v883_v6  ;;  %v1043_v6 = vld [vmem:[#allocation17 + $0xe0] sm:$0xff] }
 0x245   :  { %1327 = vmatpush.msra.mxu0 %v1149_v3  ;;  %1266 = vmatpush.msrb.mxu1 %v1043_v6  ;;  %v1059_v3 = vld [vmem:[#allocation17 + $0x160] sm:$0xff]  ;;  %v1150_v6 = vld [vmem:[#allocation17 + $0x438] sm:$0xff] }
 0x247   :  { %1328 = vmatpush.msra.mxu0 %v1142_v9  ;;  %1267 = vmatpush.msrb.mxu1 %v1036_v10  ;;  %v1143_v9 = vld [vmem:[#allocation17 + $0x400] sm:$0xff]  ;;  %v1053_v10 = vld [vmem:[#allocation17 + $0x130] sm:$0xff] }
 0x249   :  { %1268 = vmatpush.msrb.mxu1 %v1029_v16  ;;  %v1038_v16 = vld [vmem:[#allocation17 + $0xb8] sm:$0xff] }
 0x24a   :  { %v1757_v12 = vpop.eup %1756 }
 0x24b   :  { %v886_v13 = vmul.f32 %v1757_v12, %v885_v11  ;;  %v1037_v11 = vld [vmem:[#allocation17 + $0xb0] sm:$0xff]  ;;  %1269 = vmatpush.msrb.mxu1 %v1022_v23 }
 0x24c   :  { %1307 = vmatpush.msrb.mxu3 %v1037_v11  ;;  %v1144_v11 = vld [vmem:[#allocation17 + $0x408] sm:$0xff]  ;;  %v1017_v23 = vld [vmem:[#allocation17 + $0x10] sm:$0xff] }
 0x24d   :  { %v887_v14 = vadd.f32 %v886_v13, %v858_v63  ;;  %v1155_v63 = vld [vmem:[#allocation17 + $0x460] sm:$0xff]  ;;  %v1134_v13 = vld [vmem:[#allocation17 + $0x3b8] sm:$0xff]  ;;  %1270 = vmatpush.msrb.mxu1 %v1015_v27 }
 0x24e   :  { %1286 = vmatpush.msrb.mxu2 %v1155_v63  ;;  %1308 = vmatpush.msrb.mxu3 %v1030_v17  ;;  %v1165_v63 = vld [vmem:[#allocation17 + $0x4b0] sm:$0xff] }
 0x24f   :  { %924 = vmatmul.f32.vlgmr.msra.gmra.mxu2 %v887_v14  ;;  %v1135_v14 = vld [vmem:[#allocation17 + $0x3c0] sm:$0xff]  ;;  %1335 = vmatpush.msra.mxu1 %v1122_v31  ;;  %v1129_v17 = vld [vmem:[#allocation17 + $0x390] sm:$0xff]  ;;  %v1236_v31 = vld [vmem:[#allocation17 + $0x6e8] sm:$0xff] }
 0x250   :  { %1287 = vmatpush.msrb.mxu2 %v1148_v2  ;;  %1329 = vmatpush.msra.mxu0 %v1135_v14  ;;  %v1158_v2 = vld [vmem:[#allocation17 + $0x478] sm:$0xff] }
 0x251   :  { %1309 = vmatpush.msrb.mxu3 %v1023_v24  ;;  %1336 = vmatpush.msra.mxu1 %v1115_v35  ;;  %v1046_v14 = vld [vmem:[#allocation17 + $0xf8] sm:$0xff]  ;;  %v1229_v35 = vld [vmem:[#allocation17 + $0x6b0] sm:$0xff] }
 0x252   :  { %1288 = vmatpush.msrb.mxu2 %v1141_v8  ;;  %1330 = vmatpush.msra.mxu0 %v1128_v19  ;;  %v1052_v8 = vld [vmem:[#allocation17 + $0x128] sm:$0xff]  ;;  %v1130_v19 = vld [vmem:[#allocation17 + $0x398] sm:$0xff] }
 0x253   :  { %1310 = vmatpush.msrb.mxu3 %v1016_v28  ;;  %1337 = vmatpush.msra.mxu1 %v1108_v44  ;;  %v1018_v24 = vld [vmem:[#allocation17 + $0x18] sm:$0xff]  ;;  %v1223_v44 = vld [vmem:[#allocation17 + $0x680] sm:$0xff] }
 0x254   :  { %1289 = vmatpush.msrb.mxu2 %v1134_v13  ;;  %v1136_v13 = vld [vmem:[#allocation17 + $0x3c8] sm:$0xff] }
 0x255   :  { %1338 = vmatpush.msra.mxu1 %v1101_v43 }
 0x256   :  { %1290 = vmatpush.msrb.mxu2 %v1127_v18  ;;  %v1039_v18 = vld [vmem:[#allocation17 + $0xc0] sm:$0xff] }
 0x257   :  { %1339 = vmatpush.msra.mxu1 %v1094_v49  ;;  %v1208_v49 = vld [vmem:[#allocation17 + $0x608] sm:$0xff] }
 0x258   :  { %1355 = vmatpush.msra.mxu2 %v1234_v21  ;;  %v1032_v21 = vld [vmem:[#allocation17 + $0x88] sm:$0xff] }
 0x259   :  { %1340 = vmatpush.msra.mxu1 %v1087_v52  ;;  %v1201_v52 = vld [vmem:[#allocation17 + $0x5d0] sm:$0xff] }
 0x25a   :  { %1356 = vmatpush.msra.mxu2 %v1227_v25  ;;  %v963_v25 = vld [vmem:[#allocation16] sm:$0x3] }
 0x25b   :  { %1341 = vmatpush.msra.mxu1 %v1080_v55  ;;  %v1194_v55 = vld [vmem:[#allocation17 + $0x598] sm:$0xff] }
 0x25c   :  { %1357 = vmatpush.msra.mxu2 %v1220_v29 }
 0x25d   :  { %1342 = vmatpush.msra.mxu1 %v1073_v59  ;;  %v1187_v59 = vld [vmem:[#allocation17 + $0x560] sm:$0xff] }
 0x25e   :  { %1358 = vmatpush.msra.mxu2 %v1213_v34 }
 0x25f   :  { %1343 = vmatpush.msra.mxu1 %v1066_v61  ;;  %v1180_v61 = vld [vmem:[#allocation17 + $0x528] sm:$0xff] }
 0x260   :  { %1359 = vmatpush.msra.mxu2 %v1206_v38 }
 0x261   :  { %1344 = vmatpush.msra.mxu1 %v1059_v3  ;;  %v1173_v3 = vld [vmem:[#allocation17 + $0x4f0] sm:$0xff] }
 0x262   :  { %1360 = vmatpush.msra.mxu2 %v1199_v41  ;;  %v1124_v41 = vld [vmem:[#allocation17 + $0x368] sm:$0xff] }
 0x263   :  { %1345 = vmatpush.msra.mxu1 %v1052_v8  ;;  %v1166_v8 = vld [vmem:[#allocation17 + $0x4b8] sm:$0xff] }
 0x264   :  { %1361 = vmatpush.msra.mxu2 %v1192_v47  ;;  %v1216_v47 = vld [vmem:[#allocation17 + $0x648] sm:$0xff] }
 0x266   :  { %1362 = vmatpush.msra.mxu2 %v1185_v51  ;;  %v1209_v51 = vld [vmem:[#allocation17 + $0x610] sm:$0xff] }
 0x268   :  { %1363 = vmatpush.msra.mxu2 %v1178_v53  ;;  %v1202_v53 = vld [vmem:[#allocation17 + $0x5d8] sm:$0xff] }
 0x26a   :  { %1364 = vmatpush.msra.mxu2 %v1171_v57  ;;  %v1195_v57 = vld [vmem:[#allocation17 + $0x5a0] sm:$0xff] }
 0x26c   :  { %1365 = vmatpush.msra.mxu2 %v1164_v60  ;;  %v1188_v60 = vld [vmem:[#allocation17 + $0x568] sm:$0xff] }
 0x26e   :  { %1366 = vmatpush.msra.mxu2 %v1157_v0  ;;  %v1181_v0 = vld [vmem:[#allocation17 + $0x530] sm:$0xff] }
 0x270   :  { %1367 = vmatpush.msra.mxu2 %v1150_v6  ;;  %v1174_v6 = vld [vmem:[#allocation17 + $0x4f8] sm:$0xff] }
 0x272   :  { %1368 = vmatpush.msra.mxu2 %v1143_v9  ;;  %v1076_v9 = vld [vmem:[#allocation17 + $0x1e8] sm:$0xff] }
 0x274   :  { %1369 = vmatpush.msra.mxu2 %v1136_v13  ;;  %v1069_v13 = vld [vmem:[#allocation17 + $0x1b0] sm:$0xff] }
 0x276   :  { %1370 = vmatpush.msra.mxu2 %v1129_v17  ;;  %v1062_v17 = vld [vmem:[#allocation17 + $0x178] sm:$0xff] }
 0x2d2   :  { %v925_v12 = vpop.f32.mrf.mxu2 }
 0x2d3   :  { %v926_v15 = vadd.f32 %v1755_v4, %v925_v12  ;;  %v1060_v4 = vld [vmem:[#allocation17 + $0x168] sm:$0xff]  ;;  %v1045_v12 = vld [vmem:[#allocation17 + $0xf0] sm:$0xff] }
 0x2d4   :  { %1346 = vmatpush.msra.mxu1 %v1045_v12  ;;  %v1159_v12 = vld [vmem:[#allocation17 + $0x480] sm:$0xff] }
 0x2d5   :  { %vm928_vm3 = vcmp.ge.f32.partialorder %v926_v15, 0.0  ;;  %v929_v20 = vmul.f32 0.1, %v926_v15 }
 0x2d6   :  { %1347 = vmatpush.msra.mxu1 %v1038_v16  ;;  %v1152_v16 = vld [vmem:[#allocation17 + $0x448] sm:$0xff] }
 0x2d7   :  { %v930_v22 = vsel %vm928_vm3, %v926_v15, %v929_v20  ;;  %v1137_v15 = vld [vmem:[#allocation17 + $0x3d0] sm:$0xff]  ;;  %v1031_v20 = vld [vmem:[#allocation17 + $0x80] sm:$0xff] }
 0x2d8   :  { %985 = vmatmul.f32.vlgmr.msra.gmra.mxu3 %v930_v22  ;;  %1005 = vmatmul.f32.vlgmr.msrb.gmra.mxu0 %v930_v22  ;;  %v1025_v22 = vld [vmem:[#allocation17 + $0x50] sm:$0xff] }
 0x2d9   :  { %1395 = vmatpush.msrb.mxu0 %v1235_v32  ;;  %1375 = vmatpush.msra.mxu3 %v1123_v33  ;;  %v1024_v32 = vld [vmem:[#allocation17 + $0x48] sm:$0xff]  ;;  %v1237_v33 = vld [vmem:[#allocation17 + $0x6f0] sm:$0xff] }
 0x2da   :  { %1348 = vmatpush.msra.mxu1 %v1031_v20  ;;  %v1145_v20 = vld [vmem:[#allocation17 + $0x410] sm:$0xff] }
 0x2db   :  { %1396 = vmatpush.msrb.mxu0 %v1228_v26  ;;  %1376 = vmatpush.msra.mxu3 %v1116_v37  ;;  %v966_v26 = vperm.slane %v963_v25, 1  ;;  %v1230_v37 = vld [vmem:[#allocation17 + $0x6b8] sm:$0xff] }
 0x2dc   :  { %1349 = vmatpush.msra.mxu1 %v1024_v32  ;;  %v1146_v32 = vld [vmem:[#allocation17 + $0x418] sm:$0xff] }
 0x2dd   :  { %1397 = vmatpush.msrb.mxu0 %v1221_v30  ;;  %1377 = vmatpush.msra.mxu3 %v1109_v40  ;;  %v965_v30 = vperm.slane %v963_v25, 0  ;;  %v1139_v25 = vld [vmem:[#allocation17 + $0x3e0] sm:$0xff] }
 0x2de   :  { %1350 = vmatpush.msra.mxu1 %v1017_v23  ;;  %v1138_v23 = vld [vmem:[#allocation17 + $0x3d8] sm:$0xff] }
 0x2df   :  { %1398 = vmatpush.msrb.mxu0 %v1214_v36  ;;  %1378 = vmatpush.msra.mxu3 %v1102_v45  ;;  %v1125_v45 = vld [vmem:[#allocation17 + $0x370] sm:$0xff] }
 0x2e1   :  { %1399 = vmatpush.msrb.mxu0 %v1207_v39  ;;  %1379 = vmatpush.msra.mxu3 %v1095_v50  ;;  %v1222_v39 = vld [vmem:[#allocation17 + $0x678] sm:$0xff] }
 0x2e2   :  { %v1118_v50 = vld [vmem:[#allocation17 + $0x338] sm:$0xff] }
 0x2e3   :  { %1400 = vmatpush.msrb.mxu0 %v1200_v42  ;;  %1380 = vmatpush.msra.mxu3 %v1088_v46  ;;  %v1215_v42 = vld [vmem:[#allocation17 + $0x640] sm:$0xff] }
 0x2e4   :  { %v1111_v46 = vld [vmem:[#allocation17 + $0x300] sm:$0xff] }
 0x2e5   :  { %1401 = vmatpush.msrb.mxu0 %v1193_v48  ;;  %1381 = vmatpush.msra.mxu3 %v1081_v56  ;;  %v1117_v48 = vld [vmem:[#allocation17 + $0x330] sm:$0xff]  ;;  %v1104_v56 = vld [vmem:[#allocation17 + $0x2c8] sm:$0xff] }
 0x2e7   :  { %1402 = vmatpush.msrb.mxu0 %v1186_v1  ;;  %1382 = vmatpush.msra.mxu3 %v1074_v5  ;;  %v1110_v1 = vld [vmem:[#allocation17 + $0x2f8] sm:$0xff]  ;;  %v1097_v5 = vld [vmem:[#allocation17 + $0x290] sm:$0xff] }
 0x2e9   :  { %1403 = vmatpush.msrb.mxu0 %v1179_v54  ;;  %1383 = vmatpush.msra.mxu3 %v1067_v62  ;;  %v1103_v54 = vld [vmem:[#allocation17 + $0x2c0] sm:$0xff]  ;;  %v1090_v62 = vld [vmem:[#allocation17 + $0x258] sm:$0xff] }
 0x2eb   :  { %1404 = vmatpush.msrb.mxu0 %v1172_v58  ;;  %1384 = vmatpush.msra.mxu3 %v1060_v4  ;;  %v1096_v58 = vld [vmem:[#allocation17 + $0x288] sm:$0xff]  ;;  %v1083_v4 = vld [vmem:[#allocation17 + $0x220] sm:$0xff] }
 0x2ed   :  { %1405 = vmatpush.msrb.mxu0 %v1165_v63  ;;  %1385 = vmatpush.msra.mxu3 %v1053_v10  ;;  %v1089_v63 = vld [vmem:[#allocation17 + $0x250] sm:$0xff]  ;;  %v1167_v10 = vld [vmem:[#allocation17 + $0x4c0] sm:$0xff] }
 0x2ef   :  { %1406 = vmatpush.msrb.mxu0 %v1158_v2  ;;  %1386 = vmatpush.msra.mxu3 %v1046_v14  ;;  %v1082_v2 = vld [vmem:[#allocation17 + $0x218] sm:$0xff]  ;;  %v1160_v14 = vld [vmem:[#allocation17 + $0x488] sm:$0xff] }
 0x2f1   :  { %1407 = vmatpush.msrb.mxu0 %v1151_v7  ;;  %1387 = vmatpush.msra.mxu3 %v1039_v18  ;;  %v1075_v7 = vld [vmem:[#allocation17 + $0x1e0] sm:$0xff]  ;;  %v1153_v18 = vld [vmem:[#allocation17 + $0x450] sm:$0xff] }
 0x2f3   :  { %1408 = vmatpush.msrb.mxu0 %v1144_v11  ;;  %1388 = vmatpush.msra.mxu3 %v1032_v21  ;;  %v1068_v11 = vld [vmem:[#allocation17 + $0x1a8] sm:$0xff]  ;;  %v1055_v21 = vld [vmem:[#allocation17 + $0x140] sm:$0xff] }
 0x2f5   :  { %1409 = vmatpush.msrb.mxu0 %v1137_v15  ;;  %1389 = vmatpush.msra.mxu3 %v1025_v22  ;;  %v1061_v15 = vld [vmem:[#allocation17 + $0x170] sm:$0xff]  ;;  %v1047_v22 = vld [vmem:[#allocation17 + $0x100] sm:$0xff] }
 0x2f7   :  { %1410 = vmatpush.msrb.mxu0 %v1130_v19  ;;  %1390 = vmatpush.msra.mxu3 %v1018_v24  ;;  %v1054_v19 = vld [vmem:[#allocation17 + $0x138] sm:$0xff]  ;;  %v1048_v24 = vld [vmem:[#allocation17 + $0x108] sm:$0xff] }
 0x355   :  { %v1006_v27 = vpop.f32.mrf.mxu0 }
 0x356   :  { %v1007_v28 = vadd.f32 %v1006_v27, %v966_v26  ;;  %v1040_v26 = vld [vmem:[#allocation17 + $0xc8] sm:$0xff]  ;;  %v1131_v27 = vld [vmem:[#allocation17 + $0x3a0] sm:$0xff] }
 0x358   :  { %vm1010_vm4 = vcmp.ge.f32.partialorder %v1007_v28, 0.0  ;;  %v1012_v29 = vmul.f32 0.1, %v1007_v28 }
 0x35a   :  { %v2291_v34 = vsel %vm1010_vm4, %v1007_v28, %v1012_v29  ;;  %v1041_v28 = vld [vmem:[#allocation17 + $0xd0] sm:$0xff]  ;;  %v1132_v29 = vld [vmem:[#allocation17 + $0x3a8] sm:$0xff] }
 0x35b   :  { %v986_v36 = vpop.f32.mrf.mxu3  ;;  %1291 = vmatmul.f32.vlgmr.msrb.gmra.mxu2 %v2291_v34  ;;  %1331 = vmatmul.f32.vlgmr.msra.gmra.mxu0 %v2291_v34 }
 0x35c   :  { %v987_v38 = vadd.f32 %v986_v36, %v965_v30  ;;  %1435 = vmatpush.msrb.mxu2 %v1236_v31  ;;  %1475 = vmatpush.msra.mxu0 %v1237_v33  ;;  %v1238_v30 = vld [vmem:[#allocation17 + $0x6f8] sm:$0xff]  ;;  %v1033_v31 = vld [vmem:[#allocation17 + $0x90] sm:$0xff]  ;;  %v1231_v36 = vld [vmem:[#allocation17 + $0x6c0] sm:$0xff] }
 0x35d   :  { %v1034_v33 = vld [vmem:[#allocation17 + $0x98] sm:$0xff] }
 0x35e   :  { %vm1009_vm5 = vcmp.ge.f32.partialorder %v987_v38, 0.0  ;;  %v1011_v40 = vmul.f32 0.1, %v987_v38  ;;  %1436 = vmatpush.msrb.mxu2 %v1229_v35  ;;  %1476 = vmatpush.msra.mxu0 %v1230_v37  ;;  %v1026_v35 = vld [vmem:[#allocation17 + $0x58] sm:$0xff]  ;;  %v1027_v37 = vld [vmem:[#allocation17 + $0x60] sm:$0xff] }
 0x360   :  { %v2295_v43 = vsel %vm1009_vm5, %v987_v38, %v1011_v40  ;;  %1437 = vmatpush.msrb.mxu2 %v1222_v39  ;;  %1477 = vmatpush.msra.mxu0 %v1223_v44  ;;  %v1224_v38 = vld [vmem:[#allocation17 + $0x688] sm:$0xff]  ;;  %v1019_v39 = vld [vmem:[#allocation17 + $0x20] sm:$0xff]  ;;  %v1126_v40 = vld [vmem:[#allocation17 + $0x378] sm:$0xff] }
 0x361   :  { %1271 = vmatmul.f32.vlgmr.msrb.gmra.mxu1 %v2295_v43  ;;  %1311 = vmatmul.f32.vlgmr.msrb.gmra.mxu3 %v2295_v43  ;;  %v1020_v44 = vld [vmem:[#allocation17 + $0x28] sm:$0xff] }
 0x362   :  { %1415 = vmatpush.msrb.mxu1 %v1124_v41  ;;  %1438 = vmatpush.msrb.mxu2 %v1215_v42  ;;  %v1217_v41 = vld [vmem:[#allocation17 + $0x650] sm:$0xff]  ;;  %v1119_v42 = vld [vmem:[#allocation17 + $0x340] sm:$0xff] }
 0x363   :  { %1455 = vmatpush.msrb.mxu3 %v1125_v45  ;;  %1478 = vmatpush.msra.mxu0 %v1216_v47  ;;  %v1210_v45 = vld [vmem:[#allocation17 + $0x618] sm:$0xff]  ;;  %v1112_v47 = vld [vmem:[#allocation17 + $0x308] sm:$0xff] }
 0x364   :  { %1371 = vmatmul.f32.vlgmr.msra.gmra.mxu2 %v2291_v34  ;;  %1411 = vmatmul.f32.vlgmr.msrb.gmra.mxu0 %v2291_v34 }
 0x365   :  { %1416 = vmatpush.msrb.mxu1 %v1117_v48  ;;  %1439 = vmatpush.msrb.mxu2 %v1208_v49  ;;  %v1203_v48 = vld [vmem:[#allocation17 + $0x5e0] sm:$0xff]  ;;  %v1105_v49 = vld [vmem:[#allocation17 + $0x2d0] sm:$0xff] }
 0x366   :  { %1456 = vmatpush.msrb.mxu3 %v1118_v50  ;;  %1479 = vmatpush.msra.mxu0 %v1209_v51  ;;  %v1196_v50 = vld [vmem:[#allocation17 + $0x5a8] sm:$0xff]  ;;  %v1098_v51 = vld [vmem:[#allocation17 + $0x298] sm:$0xff] }
 0x367   :  { %1417 = vmatpush.msrb.mxu1 %v1110_v1  ;;  %1440 = vmatpush.msrb.mxu2 %v1201_v52  ;;  %v1189_v1 = vld [vmem:[#allocation17 + $0x570] sm:$0xff]  ;;  %v1091_v52 = vld [vmem:[#allocation17 + $0x260] sm:$0xff] }
 0x368   :  { %1457 = vmatpush.msrb.mxu3 %v1111_v46  ;;  %1480 = vmatpush.msra.mxu0 %v1202_v53  ;;  %v1182_v46 = vld [vmem:[#allocation17 + $0x538] sm:$0xff]  ;;  %v1084_v53 = vld [vmem:[#allocation17 + $0x228] sm:$0xff] }
 0x369   :  { %1418 = vmatpush.msrb.mxu1 %v1103_v54  ;;  %1441 = vmatpush.msrb.mxu2 %v1194_v55  ;;  %v1175_v54 = vld [vmem:[#allocation17 + $0x500] sm:$0xff]  ;;  %v1077_v55 = vld [vmem:[#allocation17 + $0x1f0] sm:$0xff] }
 0x36a   :  { %1458 = vmatpush.msrb.mxu3 %v1104_v56  ;;  %1481 = vmatpush.msra.mxu0 %v1195_v57  ;;  %v1168_v56 = vld [vmem:[#allocation17 + $0x4c8] sm:$0xff]  ;;  %v1070_v57 = vld [vmem:[#allocation17 + $0x1b8] sm:$0xff] }
 0x36b   :  { %1351 = vmatmul.f32.vlgmr.msra.gmra.mxu1 %v2295_v43  ;;  %1391 = vmatmul.f32.vlgmr.msra.gmra.mxu3 %v2295_v43 }
 0x36c   :  { %1419 = vmatpush.msrb.mxu1 %v1096_v58  ;;  %1442 = vmatpush.msrb.mxu2 %v1187_v59  ;;  %v1161_v58 = vld [vmem:[#allocation17 + $0x490] sm:$0xff]  ;;  %v1063_v59 = vld [vmem:[#allocation17 + $0x180] sm:$0xff] }
 0x36d   :  { %1459 = vmatpush.msrb.mxu3 %v1097_v5  ;;  %1482 = vmatpush.msra.mxu0 %v1188_v60  ;;  %v1154_v5 = vld [vmem:[#allocation17 + $0x458] sm:$0xff]  ;;  %v1056_v60 = vld [vmem:[#allocation17 + $0x148] sm:$0xff] }
 0x36e   :  { %1420 = vmatpush.msrb.mxu1 %v1089_v63  ;;  %1443 = vmatpush.msrb.mxu2 %v1180_v61  ;;  %v1147_v63 = vld [vmem:[#allocation17 + $0x420] sm:$0xff]  ;;  %v1049_v61 = vld [vmem:[#allocation17 + $0x110] sm:$0xff] }
 0x36f   :  { %1460 = vmatpush.msrb.mxu3 %v1090_v62  ;;  %1483 = vmatpush.msra.mxu0 %v1181_v0  ;;  %v1140_v62 = vld [vmem:[#allocation17 + $0x3e8] sm:$0xff]  ;;  %v1042_v0 = vld [vmem:[#allocation17 + $0xd8] sm:$0xff] }
 0x370   :  { %1421 = vmatpush.msrb.mxu1 %v1082_v2  ;;  %1444 = vmatpush.msrb.mxu2 %v1173_v3  ;;  %v1133_v2 = vld [vmem:[#allocation17 + $0x3b0] sm:$0xff]  ;;  %v1035_v3 = vld [vmem:[#allocation17 + $0xa0] sm:$0xff] }
 0x371   :  { %1461 = vmatpush.msrb.mxu3 %v1083_v4  ;;  %1484 = vmatpush.msra.mxu0 %v1174_v6  ;;  %v1028_v4 = vld [vmem:[#allocation17 + $0x68] sm:$0xff]  ;;  %v1021_v6 = vld [vmem:[#allocation17 + $0x30] sm:$0xff] }
 0x372   :  { %1422 = vmatpush.msrb.mxu1 %v1075_v7  ;;  %1445 = vmatpush.msrb.mxu2 %v1166_v8 }
 0x373   :  { %1462 = vmatpush.msrb.mxu3 %v1076_v9  ;;  %1485 = vmatpush.msra.mxu0 %v1167_v10 }
 0x374   :  { %1423 = vmatpush.msrb.mxu1 %v1068_v11  ;;  %1446 = vmatpush.msrb.mxu2 %v1159_v12 }
 0x375   :  { %1463 = vmatpush.msrb.mxu3 %v1069_v13  ;;  %1486 = vmatpush.msra.mxu0 %v1160_v14 }
 0x376   :  { %1424 = vmatpush.msrb.mxu1 %v1061_v15  ;;  %1447 = vmatpush.msrb.mxu2 %v1152_v16 }
 0x377   :  { %1464 = vmatpush.msrb.mxu3 %v1062_v17  ;;  %1487 = vmatpush.msra.mxu0 %v1153_v18 }
 0x378   :  { %1425 = vmatpush.msrb.mxu1 %v1054_v19  ;;  %1448 = vmatpush.msrb.mxu2 %v1145_v20 }
 0x379   :  { %1465 = vmatpush.msrb.mxu3 %v1055_v21  ;;  %1488 = vmatpush.msra.mxu0 %v1146_v32 }
 0x37a   :  { %1426 = vmatpush.msrb.mxu1 %v1047_v22  ;;  %1449 = vmatpush.msrb.mxu2 %v1138_v23 }
 0x37b   :  { %1466 = vmatpush.msrb.mxu3 %v1048_v24  ;;  %1489 = vmatpush.msra.mxu0 %v1139_v25 }
 0x37c   :  { %1427 = vmatpush.msrb.mxu1 %v1040_v26  ;;  %1450 = vmatpush.msrb.mxu2 %v1131_v27 }
 0x37d   :  { %1467 = vmatpush.msrb.mxu3 %v1041_v28  ;;  %1490 = vmatpush.msra.mxu0 %v1132_v29 }
 0x37e   :  { %1451 = vmatmul.f32.vlgmr.msrb.gmra.mxu2 %v2291_v34  ;;  %1491 = vmatmul.f32.vlgmr.msra.gmra.mxu0 %v2291_v34 }
 0x37f   :  { %1515 = vmatpush.msra.mxu2 %v1238_v30  ;;  %1428 = vmatpush.msrb.mxu1 %v1033_v31 }
 0x380   :  { %1468 = vmatpush.msrb.mxu3 %v1034_v33 }
 0x381   :  { %1516 = vmatpush.msra.mxu2 %v1231_v36  ;;  %1429 = vmatpush.msrb.mxu1 %v1026_v35 }
 0x382   :  { %1469 = vmatpush.msrb.mxu3 %v1027_v37 }
 0x383   :  { %1517 = vmatpush.msra.mxu2 %v1224_v38  ;;  %1430 = vmatpush.msrb.mxu1 %v1019_v39 }
 0x384   :  { %1470 = vmatpush.msrb.mxu3 %v1020_v44  ;;  %1431 = vmatmul.f32.vlgmr.msrb.gmra.mxu1 %v2295_v43 }
 0x385   :  { %1471 = vmatmul.f32.vlgmr.msrb.gmra.mxu3 %v2295_v43  ;;  %1495 = vmatpush.msra.mxu1 %v1126_v40 }
 0x386   :  { %1518 = vmatpush.msra.mxu2 %v1217_v41 }
 0x387   :  { %1496 = vmatpush.msra.mxu1 %v1119_v42 }
 0x388   :  { %1519 = vmatpush.msra.mxu2 %v1210_v45 }
 0x389   :  { %1497 = vmatpush.msra.mxu1 %v1112_v47 }
 0x38a   :  { %1520 = vmatpush.msra.mxu2 %v1203_v48 }
 0x38b   :  { %1498 = vmatpush.msra.mxu1 %v1105_v49 }
 0x38c   :  { %1521 = vmatpush.msra.mxu2 %v1196_v50 }
 0x38d   :  { %1499 = vmatpush.msra.mxu1 %v1098_v51 }
 0x38e   :  { %1522 = vmatpush.msra.mxu2 %v1189_v1 }
 0x38f   :  { %1500 = vmatpush.msra.mxu1 %v1091_v52 }
 0x390   :  { %1523 = vmatpush.msra.mxu2 %v1182_v46 }
 0x391   :  { %1501 = vmatpush.msra.mxu1 %v1084_v53 }
 0x392   :  { %1524 = vmatpush.msra.mxu2 %v1175_v54 }
 0x393   :  { %1502 = vmatpush.msra.mxu1 %v1077_v55 }
 0x394   :  { %1525 = vmatpush.msra.mxu2 %v1168_v56 }
 0x395   :  { %1503 = vmatpush.msra.mxu1 %v1070_v57 }
 0x396   :  { %1526 = vmatpush.msra.mxu2 %v1161_v58 }
 0x397   :  { %1504 = vmatpush.msra.mxu1 %v1063_v59 }
 0x398   :  { %1527 = vmatpush.msra.mxu2 %v1154_v5 }
 0x399   :  { %1505 = vmatpush.msra.mxu1 %v1056_v60 }
 0x39a   :  { %1528 = vmatpush.msra.mxu2 %v1147_v63 }
 0x39b   :  { %1506 = vmatpush.msra.mxu1 %v1049_v61 }
 0x39c   :  { %1529 = vmatpush.msra.mxu2 %v1140_v62 }
 0x39d   :  { %1507 = vmatpush.msra.mxu1 %v1042_v0 }
 0x39e   :  { %1530 = vmatpush.msra.mxu2 %v1133_v2 }
 0x39f   :  { %1531 = vmatmul.f32.vlgmr.msra.gmra.mxu2 %v2291_v34  ;;  %1508 = vmatpush.msra.mxu1 %v1035_v3  ;;  %v2318_v34 = vld [vmem:[%s2343_s13] sm:$0xff]  ;;  %s2132_s13 = smov [#allocation19]  }
 0x3a0   :  { %v1242_v11 = vperm.slane %v2318_v34, 1  ;;  %v1243_v15 = vperm.slane %v2318_v34, 2  ;;  %v1244_v23 = vperm.slane %v2318_v34, 3  ;;  %v1245_v52 = vperm.slane %v2318_v34, 4  ;;  %s1680_s15 = sshll.u32 %s2132_s13, 4  ;;  %s1681_s15 = int_to_ptr.vmem [resolvable:$true] %s1680_s15 }
 0x3a1   :  { %1509 = vmatpush.msra.mxu1 %v1028_v4 }
 0x3a3   :  { %1510 = vmatpush.msra.mxu1 %v1021_v6 }
 0x3a4   :  { %1511 = vmatmul.f32.vlgmr.msra.gmra.mxu1 %v2295_v43  ;;  %v1241_v43 = vperm.slane %v2318_v34, 0 }
 0x3d8   :  { %v1332_v16 = vpop.f32.mrf.mxu0 }
 0x3de   :  { %v1272_v7 = vpop.f32.mrf.mxu1  ;;  %v1292_v9 = vpop.f32.mrf.mxu2 }
 0x3df   :  { %v1273_v8 = vadd.f32 %v1272_v7, %v1241_v43 }
 0x3e1   :  { %v1293_v10 = vadd.f32 %v1292_v9, %v1273_v8  ;;  %v1412_v28 = vpop.f32.mrf.mxu0  ;;  %v1246_v9 = vperm.slane %v2318_v34, 5 }
 0x3e3   :  { %v1728_v12 = vmul.f32 -1.442695, %v1293_v10 }
 0x3e4   :  { %v1312_v13 = vpop.f32.mrf.mxu3 }
 0x3e5   :  { %1758 = vpow2.f32 %v1728_v12  ;;  %v1313_v14 = vadd.f32 %v1312_v13, %v1242_v11 }
 0x3e7   :  { %v1333_v17 = vadd.f32 %v1332_v16, %v1313_v14  ;;  %v1372_v21 = vpop.f32.mrf.mxu2 }
 0x3e8   :  { %v1352_v18 = vpop.f32.mrf.mxu1 }
 0x3e9   :  { %v1729_v19 = vmul.f32 -1.442695, %v1333_v17  ;;  %v1353_v20 = vadd.f32 %v1352_v18, %v1243_v15 }
 0x3eb   :  { %v1759_v32 = vpop.eup %1758  ;;  %1760 = vpow2.f32 %v1729_v19  ;;  %v1373_v22 = vadd.f32 %v1372_v21, %v1353_v20 }
 0x3ec   :  { %v1556_v24 = vadd.f32 1.0, %v1759_v32 }
 0x3ed   :  { %v1730_v25 = vmul.f32 -1.442695, %v1373_v22 }
 0x3ee   :  { %1762 = vrcp.f32 %v1556_v24  ;;  %v1392_v26 = vpop.f32.mrf.mxu3  ;;  %v1574_v44 = vand.u32 2147483648, %v1556_v24  ;;  %v1572_v41 = vand.u32 2147483647, %v1556_v24  ;;  %vm1568_vm7 = vweird.f32 %v1556_v24 }
 0x3ef   :  { %1764 = vpow2.f32 %v1730_v25  ;;  %v1393_v27 = vadd.f32 %v1392_v26, %v1244_v23 }
 0x3f0   :  { %v1575_v49 = vor.u32 1.1754944e-38, %v1574_v44  ;;  %vm1573_vm9 = vcmp.eq.f32.partialorder %v1572_v41, 8.507059e+37  ;;  %v1247_v44 = vperm.slane %v2318_v34, 6 }
 0x3f1   :  { %v1761_v29 = vpop.eup %1760  ;;  %v1413_v30 = vadd.f32 %v1412_v28, %v1393_v27 }
 0x3f2   :  { %v1557_v31 = vadd.f32 1.0, %v1761_v29 }
 0x3f3   :  { %v1731_v33 = vmul.f32 -1.442695, %v1413_v30 }
 0x3f4   :  { %v1763_v36 = vpop.eup %1762  ;;  %1766 = vrcp.f32 %v1557_v31  ;;  %v1587_v54 = vand.u32 2147483647, %v1557_v31  ;;  %v1589_v55 = vand.u32 2147483648, %v1557_v31  ;;  %vm1583_vm11 = vweird.f32 %v1557_v31 }
 0x3f5   :  { %v1765_v35 = vpop.eup %1764  ;;  %v1564_v37 = vmul.f32 %v1763_v36, %v1556_v24  ;;  %1768 = vpow2.f32 %v1731_v33  ;;  %vm1569_vm6 = vweird.f32 %v1763_v36 }
 0x3f6   :  { %v1558_v38 = vadd.f32 1.0, %v1765_v35  ;;  %vm1570_vm8 = vmor %vm1568_vm7, %vm1569_vm6  ;;  %vm1588_vm13 = vcmp.eq.f32.partialorder %v1587_v54, 8.507059e+37  ;;  %v1590_v60 = vor.u32 1.1754944e-38, %v1589_v55 }
 0x3f7   :  { %v1565_v39 = vsub.f32 1.0, %v1564_v37 }
 0x3f8   :  { %1770 = vrcp.f32 %v1558_v38  ;;  %v1604_v63 = vand.u32 2147483648, %v1558_v38  ;;  %v1602_v2 = vand.u32 2147483647, %v1558_v38  ;;  %vm1598_vm15 = vweird.f32 %v1558_v38 }
 0x3f9   :  { %v1566_v40 = vmul.f32 %v1763_v36, %v1565_v39 }
 0x3fa   :  { %v1767_v42 = vpop.eup %1766  ;;  %v1605_v10 = vor.u32 1.1754944e-38, %v1604_v63  ;;  %vm1603_vm1 = vcmp.eq.f32.partialorder %v1602_v2, 8.507059e+37 }
 0x3fb   :  { %v1769_v45 = vpop.eup %1768  ;;  %v1567_v47 = vadd.f32 %v1763_v36, %v1566_v40  ;;  %v1579_v48 = vmul.f32 %v1767_v42, %v1557_v31  ;;  %vm1584_vm10 = vweird.f32 %v1767_v42  ;;  %v1492_v20 = vpop.f32.mrf.mxu0 }
 0x3fc   :  { %v1559_v50 = vadd.f32 1.0, %v1769_v45  ;;  %vm1585_vm12 = vmor %vm1583_vm11, %vm1584_vm10 }
 0x3fd   :  { %v1571_v51 = vsel %vm1570_vm8, %v1763_v36, %v1567_v47  ;;  %v1580_v1 = vsub.f32 1.0, %v1579_v48 }
 0x3fe   :  { %v1771_v46 = vpop.eup %1770  ;;  %v1576_v53 = vsel %vm1573_vm9, %v1575_v49, %v1571_v51  ;;  %1772 = vrcp.f32 %v1559_v50  ;;  %v1619_v15 = vand.u32 2147483648, %v1559_v50  ;;  %v1617_v18 = vand.u32 2147483647, %v1559_v50 }
 0x3ff   :  { %1668 = vst [vmem:[#allocation19] sm:$0xff] %v1576_v53  ;;  %v1581_v56 = vmul.f32 %v1767_v42, %v1580_v1  ;;  %v1594_v57 = vmul.f32 %v1771_v46, %v1558_v38  ;;  %vm1599_vm14 = vweird.f32 %v1771_v46  ;;  %vm1613_vm3 = vweird.f32 %v1559_v50 }
 0x400   :  { %vm1600_vm0 = vmor %vm1598_vm15, %vm1599_vm14  ;;  %v1620_v22 = vor.u32 1.1754944e-38, %v1619_v15  ;;  %vm1618_vm5 = vcmp.eq.f32.partialorder %v1617_v18, 8.507059e+37 }
 0x401   :  { %v1582_v58 = vadd.f32 %v1767_v42, %v1581_v56  ;;  %v1595_v59 = vsub.f32 1.0, %v1594_v57  ;;  %v1432_v5 = vpop.f32.mrf.mxu1  ;;  %v1452_v3 = vpop.f32.mrf.mxu2 }
 0x402   :  { %v1433_v61 = vadd.f32 %v1432_v5, %v1245_v52 }
 0x403   :  { %v1586_v62 = vsel %vm1585_vm12, %v1767_v42, %v1582_v58  ;;  %v1596_v0 = vmul.f32 %v1771_v46, %v1595_v59 }
 0x404   :  { %v1773_v4 = vpop.eup %1772  ;;  %v1591_v6 = vsel %vm1588_vm13, %v1590_v60, %v1586_v62  ;;  %v1453_v43 = vadd.f32 %v1452_v3, %v1433_v61 }
 0x405   :  { %1669 = vst [vmem:[#allocation19 + $0x8] sm:$0xff] %v1591_v6  ;;  %v1597_v7 = vadd.f32 %v1771_v46, %v1596_v0  ;;  %v1609_v8 = vmul.f32 %v1773_v4, %v1559_v50  ;;  %vm1614_vm2 = vweird.f32 %v1773_v4 }
 0x406   :  { %v1732_v11 = vmul.f32 -1.442695, %v1453_v43  ;;  %vm1615_vm4 = vmor %vm1613_vm3, %vm1614_vm2 }
 0x407   :  { %v1601_v12 = vsel %vm1600_vm0, %v1771_v46, %v1597_v7  ;;  %v1610_v13 = vsub.f32 1.0, %v1609_v8 }
 0x408   :  { %v1606_v14 = vsel %vm1603_vm1, %v1605_v10, %v1601_v12  ;;  %1774 = vpow2.f32 %v1732_v11  ;;  %v1472_v16 = vpop.f32.mrf.mxu3 }
 0x409   :  { %1670 = vst [vmem:[#allocation19 + $0x10] sm:$0xff] %v1606_v14  ;;  %v1611_v17 = vmul.f32 %v1773_v4, %v1610_v13  ;;  %v1473_v19 = vadd.f32 %v1472_v16, %v1246_v9 }
 0x40b   :  { %v1612_v21 = vadd.f32 %v1773_v4, %v1611_v17  ;;  %v1493_v32 = vadd.f32 %v1492_v20, %v1473_v19 }
 0x40d   :  { %v1616_v23 = vsel %vm1615_vm4, %v1773_v4, %v1612_v21  ;;  %v1733_v24 = vmul.f32 -1.442695, %v1493_v32 }
 0x40e   :  { %v1775_v25 = vpop.eup %1774  ;;  %v1621_v26 = vsel %vm1618_vm5, %v1620_v22, %v1616_v23 }
 0x40f   :  { %1671 = vst [vmem:[#allocation19 + $0x18] sm:$0xff] %v1621_v26  ;;  %v1560_v27 = vadd.f32 1.0, %v1775_v25  ;;  %1776 = vpow2.f32 %v1733_v24 }
 0x411   :  { %1778 = vrcp.f32 %v1560_v27  ;;  %v1634_v36 = vand.u32 2147483648, %v1560_v27  ;;  %v1632_v37 = vand.u32 2147483647, %v1560_v27  ;;  %vm1628_vm7 = vweird.f32 %v1560_v27 }
 0x413   :  { %v1635_v40 = vor.u32 1.1754944e-38, %v1634_v36  ;;  %vm1633_vm9 = vcmp.eq.f32.partialorder %v1632_v37, 8.507059e+37 }
 0x415   :  { %v1777_v28 = vpop.eup %1776 }
 0x416   :  { %v1561_v29 = vadd.f32 1.0, %v1777_v28 }
 0x417   :  { %v1779_v30 = vpop.eup %1778 }
 0x418   :  { %v1624_v31 = vmul.f32 %v1779_v30, %v1560_v27  ;;  %1780 = vrcp.f32 %v1561_v29  ;;  %vm1629_vm6 = vweird.f32 %v1779_v30  ;;  %v1649_v49 = vand.u32 2147483648, %v1561_v29 }
 0x419   :  { %vm1630_vm8 = vmor %vm1628_vm7, %vm1629_vm6  ;;  %v1647_v1 = vand.u32 2147483647, %v1561_v29  ;;  %vm1643_vm11 = vweird.f32 %v1561_v29 }
 0x41a   :  { %v1625_v33 = vsub.f32 1.0, %v1624_v31  ;;  %v1650_v34 = vor.u32 1.1754944e-38, %v1649_v49 }
 0x41b   :  { %vm1648_vm13 = vcmp.eq.f32.partialorder %v1647_v1, 8.507059e+37 }
 0x41c   :  { %v1626_v35 = vmul.f32 %v1779_v30, %v1625_v33 }
 0x41e   :  { %v1781_v38 = vpop.eup %1780  ;;  %v1627_v39 = vadd.f32 %v1779_v30, %v1626_v35 }
 0x41f   :  { %v1639_v41 = vmul.f32 %v1781_v38, %v1561_v29  ;;  %vm1644_vm10 = vweird.f32 %v1781_v38 }
 0x420   :  { %v1631_v42 = vsel %vm1630_vm8, %v1779_v30, %v1627_v39  ;;  %vm1645_vm12 = vmor %vm1643_vm11, %vm1644_vm10 }
 0x421   :  { %v1636_v45 = vsel %vm1633_vm9, %v1635_v40, %v1631_v42  ;;  %v1640_v47 = vsub.f32 1.0, %v1639_v41  ;;  %v1512_v48 = vpop.f32.mrf.mxu1 }
 0x422   :  { %1672 = vst [vmem:[#allocation19 + $0x20] sm:$0xff] %v1636_v45  ;;  %v1513_v50 = vadd.f32 %v1512_v48, %v1247_v44  ;;  %v1532_v52 = vpop.f32.mrf.mxu2 }
 0x423   :  { %v1641_v51 = vmul.f32 %v1781_v38, %v1640_v47 }
 0x424   :  { %v1533_v46 = vadd.f32 %v1532_v52, %v1513_v50 }
 0x425   :  { %v1642_v53 = vadd.f32 %v1781_v38, %v1641_v51 }
 0x426   :  { %v1734_v54 = vmul.f32 -1.442695, %v1533_v46 }
 0x427   :  { %v1646_v55 = vsel %vm1645_vm12, %v1781_v38, %v1642_v53 }
 0x428   :  { %v1651_v56 = vsel %vm1648_vm13, %v1650_v34, %v1646_v55  ;;  %1782 = vpow2.f32 %v1734_v54 }
 0x429   :  { %1673 = vst [vmem:[#allocation19 + $0x28] sm:$0xff] %v1651_v56 }
 0x42e   :  { %v1783_v57 = vpop.eup %1782 }
 0x42f   :  { %v1562_v58 = vadd.f32 1.0, %v1783_v57 }
 0x431   :  { %1784 = vrcp.f32 %v1562_v58  ;;  %v1664_v63 = vand.u32 2147483648, %v1562_v58  ;;  %v1662_v62 = vand.u32 2147483647, %v1562_v58  ;;  %vm1658_vm15 = vweird.f32 %v1562_v58 }
 0x433   :  { %v1665_v2 = vor.u32 1.1754944e-38, %v1664_v63  ;;  %vm1663_vm1 = vcmp.eq.f32.partialorder %v1662_v62, 8.507059e+37 }
 0x437   :  { %v1785_v59 = vpop.eup %1784 }
 0x438   :  { %v1654_v5 = vmul.f32 %v1785_v59, %v1562_v58  ;;  %vm1659_vm14 = vweird.f32 %v1785_v59 }
 0x439   :  { %vm1660_vm0 = vmor %vm1658_vm15, %vm1659_vm14 }
 0x43a   :  { %v1655_v60 = vsub.f32 1.0, %v1654_v5 }
 0x43c   :  { %v1656_v61 = vmul.f32 %v1785_v59, %v1655_v60 }
 0x43e   :  { %v1657_v0 = vadd.f32 %v1785_v59, %v1656_v61 }
 0x440   :  { %v1661_v3 = vsel %vm1660_vm0, %v1785_v59, %v1657_v0 }
 0x441   :  { %v1666_v4 = vsel %vm1663_vm1, %v1665_v2, %v1661_v3 }
 0x442   :  { %1674 = vst [vmem:[#allocation19 + $0x30] sm:$0xff] %v1666_v4 }
 0x443   :  { %1685 = dma.vmem_to_hbm [thread:$0]  %s1681_s15, 896, %s1683_s25, [#allocation4]  }
 0x444   :  { %2110 = dma.done.wait [#allocation4], 896  }
 0x445   :  { %2111 = vsyncadd [#allocation4], 4294966400 }
 0x446   :  { %2112 = dma.done.wait [#allocation21], 256  }
 0x447   :  { %2113 = vsyncadd [#allocation21], 4294967040 }
 0x448   :  { %1720 = vsyncpa [#allocation3], 1 }
 0x449   :  { %1721 = vsyncpa [#allocation6], 1 }
 0x44a   :  { %1722 = vsyncpa [#allocation9], 1 }
 0x44b   :  { %1723 = vsyncpa [#allocation12], 1 }
 0x44c   :  { %1724 = vsyncpa [#allocation15], 1 }
 0x44d   :  { %1725 = vsyncpa [#allocation18], 1 }
 0x44e   :  { %1726 = vsyncpa [#allocation4], 1 }
 0x44f   :  { %1727 = vsyncpa [#allocation21], 1 }

</bundles_post_ra>
